<compile_context>
chip_gen: v6e
topology: v6e:2x2x1
jax: 0.10.0
libtpu: 0.0.40
codegen_flags: <defaults>
</compile_context>

<pallas_src>
import jax
import jax.numpy as jnp
from jax.experimental import pallas as pl
from jax.experimental.pallas import tpu as pltpu

VOCAB = 64
DIM = 32
WINDOW = 2            # PyTorch module uses window*2 context slots
CTX = 2 * WINDOW
NIDX = CTX + 1        # [centre | context] packed into one int32 stream
BATCH = 64
TILE_B = 64           # = BATCH -> single grid step (grid-step overhead dominates here)
VP = 128              # vocab padded to one full 128-lane vreg (lane-dense)


def _softplus(x):
    # numerically-stable softplus, purely VPU/EUP elementwise ops
    return jnp.maximum(x, 0.0) + jnp.log1p(jnp.exp(-jnp.abs(x)))


def decoder_kernel(mu_l_ref, sigma_l_ref, noise_ref, idx_ref,
                   w_ref, b_ref, l_ref, s_ref, out_ref):
    tb, d = mu_l_ref.shape
    vp = w_ref.shape[1]

    mu_l = mu_l_ref[...]
    sigma_l = sigma_l_ref[...]

    # reparameterized sample
    z = mu_l + sigma_l * noise_ref[...]                                # [tb, d]

    # affine + log-sum-exp over the lane-dense (padded) vocab axis.
    # Padded columns have zero weights and a -1e30 bias -> exactly zero
    # probability mass, so lse equals the unpadded one (f32 only).
    logits = jnp.dot(z, w_ref[...],
                     preferred_element_type=jnp.float32) + b_ref[...]  # [tb, vp]
    m = jnp.max(logits, axis=1, keepdims=True)                         # [tb, 1]
    shifted = logits - m
    lse = jnp.log(jnp.sum(jnp.exp(shifted), axis=1, keepdims=True))    # [tb, 1]

    # one iota shared by the context count-mask and the centre one-hot
    iota_v = jax.lax.broadcasted_iota(jnp.int32, (tb, vp), 1)
    idx = idx_ref[...]                                                 # [tb, 1+CTX]

    onehot = (iota_v == idx[:, 0:1]).astype(jnp.float32)               # centre one-hot
    cnt = jnp.zeros((tb, vp), jnp.float32)
    for j in range(1, NIDX):                                           # static unroll
        cnt = cnt + (iota_v == idx[:, j:j + 1]).astype(jnp.float32)

    # likelihood without materializing logp: every row has exactly CTX hits,
    # so sum(cnt * (shifted - lse)) = sum(cnt * shifted) - CTX * sum(lse).
    # Duplicate context ids count twice (matches torch.gather semantics).
    like = jnp.sum(cnt * shifted) - float(CTX) * jnp.sum(lse)

    # embedding gathers: two one-hot MXU matmuls against the resident tables
    # (exact: exactly one nonzero per row; padded rows are zero, never hit).
    mu_x = jnp.dot(onehot, l_ref[...], preferred_element_type=jnp.float32)   # [tb, d]
    sigma_x = _softplus(jnp.dot(onehot, s_ref[...],
                                preferred_element_type=jnp.float32))          # [tb, d]

    # KL exactly as in the PyTorch module
    a = jnp.log(sigma_x / sigma_l)
    b = (sigma_l ** 2 + (mu_l - mu_x) ** 2) / (2.0 * sigma_x ** 2)
    kl = jnp.sum(a + b - 0.5)

    # per-tile partial (likelihood, KL); summed across tiles in the wrapper
    io2 = jax.lax.broadcasted_iota(jnp.int32, (1, 2), 1)
    out_ref[...] = jnp.where(io2 == 0, like, kl)


def decoder_forward(mu_l, sigma_l, centre, context, noise, w, bias, l_tab, s_tab,
                    *, tile_b=TILE_B):
    B, D = mu_l.shape
    V = w.shape[1]
    tile_b = min(tile_b, B)
    assert B % tile_b == 0
    n_tiles = B // tile_b

    # Lane-dense padding of the vocab axis to 128:
    #   * padded affine columns: zero weights + -1e30 bias -> zero softmax mass
    #   * padded embedding rows: zeros, never selected (indices < V)
    w_p = jnp.zeros((D, VP), w.dtype).at[:, :V].set(w)
    b_p = jnp.full((1, VP), -1e30, bias.dtype).at[:, :V].set(bias)
    l_p = jnp.zeros((VP, D), l_tab.dtype).at[:V, :].set(l_tab)
    s_p = jnp.zeros((VP, D), s_tab.dtype).at[:V, :].set(s_tab)

    # merge centre + context into a single int32 index stream (one DMA)
    idx = jnp.concatenate([centre.astype(jnp.int32),
                           context.astype(jnp.int32)], axis=1)          # [B, 1+CTX]

    batched = lambda i: (i, 0)    # per-batch-tile blocks
    resident = lambda i: (0, 0)   # constant block index -> stays VMEM-resident

    partials = pl.pallas_call(
        decoder_kernel,
        out_shape=jax.ShapeDtypeStruct((n_tiles, 2), jnp.float32),
        grid_spec=pltpu.PrefetchScalarGridSpec(
            num_scalar_prefetch=0,
            grid=(n_tiles,),
            in_specs=[
                pl.BlockSpec((tile_b, D), batched),      # mu_l
                pl.BlockSpec((tile_b, D), batched),      # sigma_l
                pl.BlockSpec((tile_b, D), batched),      # noise
                pl.BlockSpec((tile_b, NIDX), batched),   # [centre | context]
                pl.BlockSpec((D, VP), resident),         # affine.weight.T (padded)
                pl.BlockSpec((1, VP), resident),         # affine.bias (padded)
                pl.BlockSpec((VP, D), resident),         # L embedding table (padded)
                pl.BlockSpec((VP, D), resident),         # S embedding table (padded)
            ],
            out_specs=pl.BlockSpec((1, 2), batched),     # per-tile partial outputs
        ),
        compiler_params=pltpu.CompilerParams(
            dimension_semantics=("parallel",)),          # tiles are independent
    )(mu_l, sigma_l, noise, idx, w_p, b_p, l_p, s_p)

    total = jnp.sum(partials, axis=0)                    # trivial host-side reduce
    return total[0], total[1]


if __name__ == "__main__":
    key = jax.random.PRNGKey(0)
    k = jax.random.split(key, 9)

    # variational posterior params (sigma must be positive, like an encoder output)
    mu_l = jax.random.normal(k[0], (BATCH, DIM), jnp.float32)
    sigma_l = jax.nn.softplus(jax.random.normal(k[1], (BATCH, DIM), jnp.float32)) + 0.1
    # reparameterization noise (torch.randn in the module); deterministic here
    # TODO(synk): noise is drawn host-side instead of inside the kernel (matches math).
    noise = jax.random.normal(k[2], (BATCH, DIM), jnp.float32)

    # deterministic synthetic parameters (shapes from __init__)
    w = 0.1 * jax.random.normal(k[3], (DIM, VOCAB), jnp.float32)     # affine.weight.T
    bias = 0.01 * jax.random.normal(k[4], (1, VOCAB), jnp.float32)   # affine.bias
    l_tab = jax.random.normal(k[5], (VOCAB, DIM), jnp.float32)       # L embedding table
    s_tab = jax.random.normal(k[6], (VOCAB, DIM), jnp.float32)       # S embedding table

    centre = jax.random.randint(k[7], (BATCH, 1), 0, VOCAB, jnp.int32)
    context = jax.random.randint(k[8], (BATCH, CTX), 0, VOCAB, jnp.int32)

    likelihood, kl = decoder_forward(mu_l, sigma_l, centre, context,
                                     noise, w, bias, l_tab, s_tab)
    jax.block_until_ready((likelihood, kl))
    print("KERNEL_OK")
</pallas_src>

<mosaic_0001>
module attributes {stable_mosaic.version = 11 : i64} {
  func.func @decoder_kernel(%arg0: i32, %arg1: memref<64x32xf32, #tpu.memory_space<vmem>>, %arg2: memref<64x32xf32, #tpu.memory_space<vmem>>, %arg3: memref<64x32xf32, #tpu.memory_space<vmem>>, %arg4: memref<64x5xi32, #tpu.memory_space<vmem>>, %arg5: memref<32x128xf32, #tpu.memory_space<vmem>>, %arg6: memref<1x128xf32, #tpu.memory_space<vmem>>, %arg7: memref<128x32xf32, #tpu.memory_space<vmem>>, %arg8: memref<128x32xf32, #tpu.memory_space<vmem>>, %arg9: memref<1x2xf32, #tpu.memory_space<vmem>>) attributes {dimension_semantics = [#tpu.dimension_semantics<parallel>], iteration_bounds = array<i64: 1>, scalar_prefetch = 0 : i64, scratch_operands = 0 : i64, tpu.core_type = #tpu.core_type<tc>, window_params = [{transform_indices = @transform_0, window_bounds = array<i64: 64, 32>}, {transform_indices = @transform_1, window_bounds = array<i64: 64, 32>}, {transform_indices = @transform_2, window_bounds = array<i64: 64, 32>}, {transform_indices = @transform_3, window_bounds = array<i64: 64, 5>}, {pipeline_mode = #tpu.pipeline_mode<synchronous>, transform_indices = @transform_4, window_bounds = array<i64: 32, 128>}, {pipeline_mode = #tpu.pipeline_mode<synchronous>, transform_indices = @transform_5, window_bounds = array<i64: 1, 128>}, {pipeline_mode = #tpu.pipeline_mode<synchronous>, transform_indices = @transform_6, window_bounds = array<i64: 128, 32>}, {pipeline_mode = #tpu.pipeline_mode<synchronous>, transform_indices = @transform_7, window_bounds = array<i64: 128, 32>}, {transform_indices = @transform_8, window_bounds = array<i64: 1, 2>}]} {
    %c0 = arith.constant 0 : index
    %c0_0 = arith.constant 0 : index
    %0 = vector.load %arg1[%c0, %c0_0] : memref<64x32xf32, #tpu.memory_space<vmem>>, vector<64x32xf32>
    %c0_1 = arith.constant 0 : index
    %c0_2 = arith.constant 0 : index
    %1 = vector.load %arg2[%c0_1, %c0_2] : memref<64x32xf32, #tpu.memory_space<vmem>>, vector<64x32xf32>
    %c0_3 = arith.constant 0 : index
    %c0_4 = arith.constant 0 : index
    %2 = vector.load %arg3[%c0_3, %c0_4] : memref<64x32xf32, #tpu.memory_space<vmem>>, vector<64x32xf32>
    %3 = arith.mulf %1, %2 : vector<64x32xf32>
    %4 = arith.addf %0, %3 : vector<64x32xf32>
    %c0_5 = arith.constant 0 : index
    %c0_6 = arith.constant 0 : index
    %5 = vector.load %arg5[%c0_5, %c0_6] : memref<32x128xf32, #tpu.memory_space<vmem>>, vector<32x128xf32>
    %cst = arith.constant dense<0.000000e+00> : vector<64x128xf32>
    %6 = tpu.matmul %4, %5, %cst {dimension_numbers = #tpu.dot_dimension_numbers<[1], [0], [0], [1], [0, 0, 1, 1], [], []>} : vector<64x32xf32>, vector<32x128xf32>, vector<64x128xf32> -> vector<64x128xf32>
    %c0_7 = arith.constant 0 : index
    %c0_8 = arith.constant 0 : index
    %7 = vector.load %arg6[%c0_7, %c0_8] : memref<1x128xf32, #tpu.memory_space<vmem>>, vector<1x128xf32>
    %8 = vector.broadcast %7 : vector<1x128xf32> to vector<64x128xf32>
    %9 = arith.addf %6, %8 : vector<64x128xf32>
    %cst_9 = arith.constant dense<0xFF800000> : vector<64xf32>
    %10 = vector.multi_reduction <maximumf>, %9, %cst_9 [1] : vector<64x128xf32> to vector<64xf32>
    %11 = vector.shape_cast %10 : vector<64xf32> to vector<64x1xf32>
    %12 = vector.broadcast %11 : vector<64x1xf32> to vector<64x128xf32>
    %13 = arith.subf %9, %12 : vector<64x128xf32>
    %14 = math.exp %13 : vector<64x128xf32>
    %cst_10 = arith.constant dense<0.000000e+00> : vector<64xf32>
    %15 = vector.multi_reduction <add>, %14, %cst_10 [1] : vector<64x128xf32> to vector<64xf32>
    %16 = vector.shape_cast %15 : vector<64xf32> to vector<64x1xf32>
    %17 = math.log %16 : vector<64x1xf32>
    %18 = tpu.iota {dimensions = array<i32: 1>} : vector<64x128xi32>
    %c0_11 = arith.constant 0 : index
    %c0_12 = arith.constant 0 : index
    %19 = vector.load %arg4[%c0_11, %c0_12] : memref<64x5xi32, #tpu.memory_space<vmem>>, vector<64x5xi32>
    %20 = vector.extract_strided_slice %19 {offsets = [0, 0], sizes = [64, 1], strides = [1, 1]} : vector<64x5xi32> to vector<64x1xi32>
    %21 = vector.broadcast %20 : vector<64x1xi32> to vector<64x128xi32>
    %22 = arith.cmpi eq, %18, %21 : vector<64x128xi32>
    %23 = arith.extui %22 : vector<64x128xi1> to vector<64x128xi32>
    %24 = arith.sitofp %23 : vector<64x128xi32> to vector<64x128xf32>
    %cst_13 = arith.constant 0.000000e+00 : f32
    %25 = vector.broadcast %cst_13 : f32 to vector<64x128xf32>
    %26 = vector.extract_strided_slice %19 {offsets = [0, 1], sizes = [64, 1], strides = [1, 1]} : vector<64x5xi32> to vector<64x1xi32>
    %27 = vector.broadcast %26 : vector<64x1xi32> to vector<64x128xi32>
    %28 = arith.cmpi eq, %18, %27 : vector<64x128xi32>
    %29 = arith.extui %28 : vector<64x128xi1> to vector<64x128xi32>
    %30 = arith.sitofp %29 : vector<64x128xi32> to vector<64x128xf32>
    %31 = arith.addf %25, %30 : vector<64x128xf32>
    %32 = vector.extract_strided_slice %19 {offsets = [0, 2], sizes = [64, 1], strides = [1, 1]} : vector<64x5xi32> to vector<64x1xi32>
    %33 = vector.broadcast %32 : vector<64x1xi32> to vector<64x128xi32>
    %34 = arith.cmpi eq, %18, %33 : vector<64x128xi32>
    %35 = arith.extui %34 : vector<64x128xi1> to vector<64x128xi32>
    %36 = arith.sitofp %35 : vector<64x128xi32> to vector<64x128xf32>
    %37 = arith.addf %31, %36 : vector<64x128xf32>
    %38 = vector.extract_strided_slice %19 {offsets = [0, 3], sizes = [64, 1], strides = [1, 1]} : vector<64x5xi32> to vector<64x1xi32>
    %39 = vector.broadcast %38 : vector<64x1xi32> to vector<64x128xi32>
    %40 = arith.cmpi eq, %18, %39 : vector<64x128xi32>
    %41 = arith.extui %40 : vector<64x128xi1> to vector<64x128xi32>
    %42 = arith.sitofp %41 : vector<64x128xi32> to vector<64x128xf32>
    %43 = arith.addf %37, %42 : vector<64x128xf32>
    %44 = vector.extract_strided_slice %19 {offsets = [0, 4], sizes = [64, 1], strides = [1, 1]} : vector<64x5xi32> to vector<64x1xi32>
    %45 = vector.broadcast %44 : vector<64x1xi32> to vector<64x128xi32>
    %46 = arith.cmpi eq, %18, %45 : vector<64x128xi32>
    %47 = arith.extui %46 : vector<64x128xi1> to vector<64x128xi32>
    %48 = arith.sitofp %47 : vector<64x128xi32> to vector<64x128xf32>
    %49 = arith.addf %43, %48 : vector<64x128xf32>
    %50 = arith.mulf %49, %13 : vector<64x128xf32>
    %51 = vector.shape_cast %50 : vector<64x128xf32> to vector<1x64x128xf32>
    %cst_14 = arith.constant dense<0.000000e+00> : vector<1xf32>
    %52 = vector.multi_reduction <add>, %51, %cst_14 [1, 2] : vector<1x64x128xf32> to vector<1xf32>
    %53 = vector.shape_cast %52 : vector<1xf32> to vector<1x1x1xf32>
    %54 = vector.extract %53[0, 0, 0] : f32 from vector<1x1x1xf32>
    %55 = vector.shape_cast %17 : vector<64x1xf32> to vector<1x64x1xf32>
    %cst_15 = arith.constant dense<0.000000e+00> : vector<1xf32>
    %56 = vector.multi_reduction <add>, %55, %cst_15 [1, 2] : vector<1x64x1xf32> to vector<1xf32>
    %57 = vector.shape_cast %56 : vector<1xf32> to vector<1x1x1xf32>
    %58 = vector.extract %57[0, 0, 0] : f32 from vector<1x1x1xf32>
    %cst_16 = arith.constant 4.000000e+00 : f32
    %59 = arith.mulf %cst_16, %58 : f32
    %60 = arith.subf %54, %59 : f32
    %c0_17 = arith.constant 0 : index
    %c0_18 = arith.constant 0 : index
    %61 = vector.load %arg7[%c0_17, %c0_18] : memref<128x32xf32, #tpu.memory_space<vmem>>, vector<128x32xf32>
    %cst_19 = arith.constant dense<0.000000e+00> : vector<64x32xf32>
    %62 = tpu.matmul %24, %61, %cst_19 {dimension_numbers = #tpu.dot_dimension_numbers<[1], [0], [0], [1], [0, 0, 1, 1], [], []>} : vector<64x128xf32>, vector<128x32xf32>, vector<64x32xf32> -> vector<64x32xf32>
    %c0_20 = arith.constant 0 : index
    %c0_21 = arith.constant 0 : index
    %63 = vector.load %arg8[%c0_20, %c0_21] : memref<128x32xf32, #tpu.memory_space<vmem>>, vector<128x32xf32>
    %cst_22 = arith.constant dense<0.000000e+00> : vector<64x32xf32>
    %64 = tpu.matmul %24, %63, %cst_22 {dimension_numbers = #tpu.dot_dimension_numbers<[1], [0], [0], [1], [0, 0, 1, 1], [], []>} : vector<64x128xf32>, vector<128x32xf32>, vector<64x32xf32> -> vector<64x32xf32>
    %cst_23 = arith.constant 0.000000e+00 : f32
    %65 = vector.broadcast %cst_23 : f32 to vector<64x32xf32>
    %66 = arith.maximumf %64, %65 : vector<64x32xf32>
    %67 = math.absf %64 : vector<64x32xf32>
    %cst_24 = arith.constant 0.000000e+00 : f32
    %68 = vector.broadcast %cst_24 : f32 to vector<64x32xf32>
    %69 = arith.subf %68, %67 : vector<64x32xf32>
    %70 = math.exp %69 : vector<64x32xf32>
    %71 = math.log1p %70 : vector<64x32xf32>
    %72 = arith.addf %66, %71 : vector<64x32xf32>
    %73 = arith.divf %72, %1 : vector<64x32xf32>
    %74 = math.log %73 : vector<64x32xf32>
    %75 = arith.mulf %1, %1 : vector<64x32xf32>
    %76 = arith.subf %0, %62 : vector<64x32xf32>
    %77 = arith.mulf %76, %76 : vector<64x32xf32>
    %78 = arith.addf %75, %77 : vector<64x32xf32>
    %79 = arith.mulf %72, %72 : vector<64x32xf32>
    %cst_25 = arith.constant 2.000000e+00 : f32
    %80 = vector.broadcast %cst_25 : f32 to vector<64x32xf32>
    %81 = arith.mulf %80, %79 : vector<64x32xf32>
    %82 = arith.divf %78, %81 : vector<64x32xf32>
    %83 = arith.addf %74, %82 : vector<64x32xf32>
    %cst_26 = arith.constant 5.000000e-01 : f32
    %84 = vector.broadcast %cst_26 : f32 to vector<64x32xf32>
    %85 = arith.subf %83, %84 : vector<64x32xf32>
    %86 = vector.shape_cast %85 : vector<64x32xf32> to vector<1x64x32xf32>
    %cst_27 = arith.constant dense<0.000000e+00> : vector<1xf32>
    %87 = vector.multi_reduction <add>, %86, %cst_27 [1, 2] : vector<1x64x32xf32> to vector<1xf32>
    %88 = vector.shape_cast %87 : vector<1xf32> to vector<1x1x1xf32>
    %89 = vector.extract %88[0, 0, 0] : f32 from vector<1x1x1xf32>
    %90 = tpu.iota {dimensions = array<i32: 1>} : vector<1x2xi32>
    %c0_i32 = arith.constant 0 : i32
    %91 = vector.broadcast %c0_i32 : i32 to vector<1x2xi32>
    %92 = arith.cmpi eq, %90, %91 : vector<1x2xi32>
    %93 = vector.broadcast %60 : f32 to vector<1x2xf32>
    %94 = vector.broadcast %89 : f32 to vector<1x2xf32>
    %95 = arith.select %92, %93, %94 : vector<1x2xi1>, vector<1x2xf32>
    %c0_28 = arith.constant 0 : index
    %c0_29 = arith.constant 0 : index
    %96 = vector.load %arg9[%c0_28, %c0_29] : memref<1x2xf32, #tpu.memory_space<vmem>>, vector<1x2xf32>
    tpu.vector_store %arg9[%c0_28, %c0_29], %95 {strides = array<i32>} : memref<1x2xf32, #tpu.memory_space<vmem>>, vector<1x2xf32>,
    return
  }
  func.func @transform_0(%arg0: i32) -> (i32, i32) {
    %c0_i32 = arith.constant 0 : i32
    %c0_i32_0 = arith.constant 0 : i32
    return %arg0, %c0_i32 : i32, i32
  }
  func.func @transform_1(%arg0: i32) -> (i32, i32) {
    %c0_i32 = arith.constant 0 : i32
    %c0_i32_0 = arith.constant 0 : i32
    return %arg0, %c0_i32 : i32, i32
  }
  func.func @transform_2(%arg0: i32) -> (i32, i32) {
    %c0_i32 = arith.constant 0 : i32
    %c0_i32_0 = arith.constant 0 : i32
    return %arg0, %c0_i32 : i32, i32
  }
  func.func @transform_3(%arg0: i32) -> (i32, i32) {
    %c0_i32 = arith.constant 0 : i32
    %c0_i32_0 = arith.constant 0 : i32
    return %arg0, %c0_i32 : i32, i32
  }
  func.func @transform_4(%arg0: i32) -> (i32, i32) {
    %c0_i32 = arith.constant 0 : i32
    %c0_i32_0 = arith.constant 0 : i32
    %c0_i32_1 = arith.constant 0 : i32
    return %c0_i32, %c0_i32_0 : i32, i32
  }
  func.func @transform_5(%arg0: i32) -> (i32, i32) {
    %c0_i32 = arith.constant 0 : i32
    %c0_i32_0 = arith.constant 0 : i32
    %c0_i32_1 = arith.constant 0 : i32
    return %c0_i32, %c0_i32_0 : i32, i32
  }
  func.func @transform_6(%arg0: i32) -> (i32, i32) {
    %c0_i32 = arith.constant 0 : i32
    %c0_i32_0 = arith.constant 0 : i32
    %c0_i32_1 = arith.constant 0 : i32
    return %c0_i32, %c0_i32_0 : i32, i32
  }
  func.func @transform_7(%arg0: i32) -> (i32, i32) {
    %c0_i32 = arith.constant 0 : i32
    %c0_i32_0 = arith.constant 0 : i32
    %c0_i32_1 = arith.constant 0 : i32
    return %c0_i32, %c0_i32_0 : i32, i32
  }
  func.func @transform_8(%arg0: i32) -> (i32, i32) {
    %c0_i32 = arith.constant 0 : i32
    %c0_i32_0 = arith.constant 0 : i32
    return %arg0, %c0_i32 : i32, i32
  }
}

</mosaic_0001>

<bundles_post_ra>
// kernel: tpu_custom_call.1
= control target key start
LH: loop header
LB: loop body
LE: loop exit
PB: predicated region body
PF: predicated region fallthrough
CT: control target
= control target key end

     0   :  { %v1564_v3 = vmov 0   ;;  %vm81_vm0 = vcmask 261120   ;;  %v1565_v56 = vmov 3   ;;  %v1566_v58 = vmov 1   ;;  %s2261_s0 = inlined_call_operand.vmem [shape: f32[64,32], index: 0, kind: input, shape index: {}]   ;;  %s2262_s1 = inlined_call_operand.vmem [shape: f32[64,32], index: 1, kind: input, shape index: {}]   ;;  %s2263_s2 = inlined_call_operand.vmem [shape: f32[64,32], index: 2, kind: input, shape index: {}]   ;;  %s2264_s3 = inlined_call_operand.vmem [shape: s32[64,5], index: 3, kind: input, shape index: {}]   ;;  %s2265_s4 = inlined_call_operand.vmem [shape: f32[32,128], index: 4, kind: input, shape index: {}]   ;;  %s2266_s5 = inlined_call_operand.vmem [shape: f32[1,128], index: 5, kind: input, shape index: {}]   ;;  %s2267_s6 = inlined_call_operand.vmem [shape: f32[128,32], index: 6, kind: input, shape index: {}]   ;;  %s2268_s7 = inlined_call_operand.vmem [shape: f32[128,32], index: 7, kind: input, shape index: {}]   ;;  %s2269_s8 = inlined_call_operand.hbm [shape: f32[1,2], index: 8, kind: output, shape index: {}]  }
   0x1   :  { %v73_v0 = vld [vmem:[%s2265_s4 + $0x18] sm:$0xff]  ;;  %v1623_v1 = vld [vmem:[%s2264_s3] sm:$0xff]  ;;  %v72_v2 = vld [vmem:[%s2265_s4 + $0x10] sm:$0xff]  ;;  %1389 = vset.pattern.permute.xlu0 %v1564_v3  ;;  %1390 = vset.pattern.permute.xlu1 %v1564_v3 }
   0x2   :  { %1267 = vmatprep.subr.mxu0 %v73_v0  ;;  %v71_v4 = vld [vmem:[%s2265_s4 + $0x8] sm:$0xff]  ;;  %v1634_v5 = vld [vmem:[%s2264_s3 + $0x10] sm:$0xff]  ;;  %294 = vperm.xlu0 %1389, %v1623_v1   ;;  %v70_v7 = vld [vmem:[%s2265_s4] sm:$0xff] }
   0x3   :  { %1268 = vmatpush3.msra.mxu0 %v73_v0  ;;  %v1640_v6 = vld [vmem:[%s2264_s3 + $0x8] sm:$0xff]  ;;  %v1648_v8 = vld [vmem:[%s2262_s1] sm:$0xff]  ;;  %300 = vperm.xlu1 %1390, %v1634_v5   ;;  %v1672_v15 = vld [vmem:[%s2264_s3 + $0x18] sm:$0xff] }
   0x4   :  { %1269 = vmatprep.subr.mxu0 %v72_v2  ;;  %v30_v9 = vld [vmem:[%s2261_s0] sm:$0xff]  ;;  %v1659_v11 = vld [vmem:[%s2262_s1 + $0x8] sm:$0xff]  ;;  %v32_v17 = vld [vmem:[%s2261_s0 + $0x10] sm:$0xff] }
   0x5   :  { %v46_v10 = vld [vmem:[%s2263_s2] sm:$0xff]  ;;  %1270 = vmatpush3.msra.mxu0 %v72_v2  ;;  %v31_v13 = vld [vmem:[%s2261_s0 + $0x8] sm:$0xff]  ;;  %v1681_v18 = vld [vmem:[%s2262_s1 + $0x10] sm:$0xff] }
   0x6   :  { %v54_v12 = vmul.f32 %v46_v10, %v1648_v8  ;;  %v47_v14 = vld [vmem:[%s2263_s2 + $0x8] sm:$0xff]  ;;  %1271 = vmatprep.subr.mxu0 %v71_v4  ;;  %v48_v19 = vld [vmem:[%s2263_s2 + $0x10] sm:$0xff]  ;;  %297 = vperm.xlu0 %1389, %v1640_v6   ;;  %v33_v22 = vld [vmem:[%s2261_s0 + $0x18] sm:$0xff] }
   0x7   :  { %v55_v16 = vmul.f32 %v47_v14, %v1659_v11  ;;  %1272 = vmatpush3.msra.mxu0 %v71_v4  ;;  %v56_v21 = vmul.f32 %v48_v19, %v1681_v18  ;;  %v1694_v23 = vld [vmem:[%s2262_s1 + $0x18] sm:$0xff]  ;;  %v1702_v26 = vld [vmem:[%s2264_s3 + $0x20] sm:$0xff]  ;;  %v1712_v30 = vld [vmem:[%s2264_s3 + $0x28] sm:$0xff]  ;;  %303 = vperm.xlu1 %1390, %v1672_v15  }
   0x8   :  { %v62_v20 = vadd.f32 %v54_v12, %v30_v9  ;;  %v49_v24 = vld [vmem:[%s2263_s2 + $0x18] sm:$0xff]  ;;  %1273 = vmatprep.subr.mxu0 %v70_v7  ;;  %v42_v28 = vld [vmem:[%s2262_s1 + $0x20] sm:$0xff]  ;;  %v1725_v35 = vld [vmem:[%s2264_s3 + $0x30] sm:$0xff] }
   0x9   :  { %v63_v25 = vadd.f32 %v55_v16, %v31_v13  ;;  %v57_v27 = vmul.f32 %v49_v24, %v1694_v23  ;;  %1274 = vmatpush3.msra.mxu0 %v70_v7  ;;  %v64_v29 = vadd.f32 %v56_v21, %v32_v17  ;;  %v34_v31 = vld [vmem:[%s2261_s0 + $0x20] sm:$0xff]  ;;  %v43_v36 = vld [vmem:[%s2262_s1 + $0x28] sm:$0xff]  ;;  %v44_v40 = vld [vmem:[%s2262_s1 + $0x30] sm:$0xff] }
   0xa   :  { %1275 = vmatprep.mubr.msk.f32.mxu0 %vm81_vm0, %v62_v20  ;;  %v50_v32 = vld [vmem:[%s2263_s2 + $0x20] sm:$0xff]  ;;  %v51_v37 = vld [vmem:[%s2263_s2 + $0x28] sm:$0xff]  ;;  %306 = vperm.xlu0 %1389, %v1702_v26   ;;  %v52_v41 = vld [vmem:[%s2263_s2 + $0x30] sm:$0xff] }
   0xb   :  { %1276 = vmatmul.mubr.msk.f32.vlgmr.msra.gmra.mxu0 %vm81_vm0, %v63_v25  ;;  %v65_v33 = vadd.f32 %v57_v27, %v33_v22  ;;  %v58_v34 = vmul.f32 %v50_v32, %v42_v28  ;;  %v35_v38 = vld [vmem:[%s2261_s0 + $0x28] sm:$0xff]  ;;  %v59_v39 = vmul.f32 %v51_v37, %v43_v36  ;;  %v36_v43 = vld [vmem:[%s2261_s0 + $0x30] sm:$0xff]  ;;  %v60_v44 = vmul.f32 %v52_v41, %v44_v40  ;;  %v45_v45 = vld [vmem:[%s2262_s1 + $0x38] sm:$0xff] }
   0xc   :  { %1278 = vmatprep.mubr.msk.f32.mxu0 %vm81_vm0, %v64_v29  ;;  %v53_v46 = vld [vmem:[%s2263_s2 + $0x38] sm:$0xff]  ;;  %309 = vperm.xlu1 %1390, %v1712_v30   ;;  %v751_v53 = vld [vmem:[%s2268_s7 + $0x70] sm:$0xff]  ;;  %v750_v57 = vld [vmem:[%s2268_s7 + $0x68] sm:$0xff] }
   0xd   :  { %v66_v42 = vadd.f32 %v58_v34, %v34_v31  ;;  %v752_v47 = vld [vmem:[%s2268_s7 + $0x78] sm:$0xff]  ;;  %v67_v48 = vadd.f32 %v59_v39, %v35_v38  ;;  %v61_v49 = vmul.f32 %v53_v46, %v45_v45  ;;  %v68_v51 = vadd.f32 %v60_v44, %v36_v43  ;;  %v749_v59 = vld [vmem:[%s2268_s7 + $0x60] sm:$0xff]  ;;  %v630_v60 = vld [vmem:[%s2267_s6 + $0x70] sm:$0xff] }
   0xe   :  { %312 = vperm.xlu0 %1389, %v1725_v35   ;;  %v1763_v50 = vld [vmem:[%s2264_s3 + $0x38] sm:$0xff]  ;;  %1331 = vmatprep.subr.mxu0 %v752_v47 }
   0xf   :  { %1279 = vmatmul.mubr.msk.f32.gmra.mxu0 %vm81_vm0, %v65_v33  ;;  %v37_v52 = vld [vmem:[%s2261_s0 + $0x38] sm:$0xff] }
  0x10   :  { %1281 = vmatprep.mubr.msk.f32.mxu0 %vm81_vm0, %v66_v42  ;;  %1332 = vmatpush3.msra.mxu0 %v752_v47  ;;  %v69_v54 = vadd.f32 %v61_v49, %v37_v52  ;;  %v631_v55 = vld [vmem:[%s2267_s6 + $0x78] sm:$0xff] }
  0x11   :  { %315 = vperm.xlu1 %1390, %v1763_v50   ;;  %1333 = vmatprep.subr.mxu0 %v751_v53 }
  0x12   :  { %1398 = vset.pattern.permute.xlu0 %v1565_v56  ;;  %1334 = vmatpush3.msra.mxu0 %v751_v53 }
  0x13   :  { %1282 = vmatmul.mubr.msk.f32.gmra.mxu0 %vm81_vm0, %v67_v48  ;;  %460 = vperm.xlu0 %1398, %v1634_v5  }
  0x14   :  { %1284 = vmatprep.mubr.msk.f32.mxu0 %vm81_vm0, %v68_v51  ;;  %1287 = vmatprep.subr.mxu1 %v631_v55 }
  0x15   :  { %1391 = vset.pattern.permute.xlu1 %v1566_v58  ;;  %1335 = vmatprep.subr.mxu0 %v750_v57 }
  0x16   :  { %342 = vperm.xlu1 %1391, %v1623_v1  }
  0x17   :  { %1285 = vmatmul.mubr.msk.f32.gmra.mxu0 %vm81_vm0, %v69_v54 }
  0x18   :  { %13 = vsyncpa [#allocation3], 0  ;;  %466 = vperm.xlu0 %1398, %v1702_v26   ;;  %1336 = vmatpush3.msra.mxu0 %v750_v57  ;;  %v748_v61 = vld [vmem:[%s2268_s7 + $0x58] sm:$0xff]  ;;  %v1567_v62 = vmov 2   ;;  %v747_v63 = vld [vmem:[%s2268_s7 + $0x50] sm:$0xff]  ;;  %v1568_v33 = vmov 4  }
  0x19   :  { %1337 = vmatprep.subr.mxu0 %v749_v59  ;;  %1288 = vmatpush3.msra.mxu1 %v631_v55  ;;  %v629_v0 = vld [vmem:[%s2267_s6 + $0x68] sm:$0xff]  ;;  %v745_v3 = vld [vmem:[%s2268_s7 + $0x40] sm:$0xff]  ;;  %v744_v4 = vld [vmem:[%s2268_s7 + $0x38] sm:$0xff]  ;;  %v1569_v37 = vmov 1.0   ;;  %v1570_v46 = vmov 0.0   ;;  %s1571_s24 = smov [#allocation2]  }
  0x1a   :  { %1338 = vmatpush3.msra.mxu0 %v749_v59  ;;  %1289 = vmatprep.subr.mxu1 %v630_v60  ;;  %v746_v2 = vld [vmem:[%s2268_s7 + $0x48] sm:$0xff]  ;;  %v743_v7 = vld [vmem:[%s2268_s7 + $0x30] sm:$0xff]  ;;  %v628_v9 = vld [vmem:[%s2267_s6 + $0x60] sm:$0xff]  ;;  %s1126_s25 = sshll.u32 %s1571_s24, 4  ;;  %s1127_s25 = int_to_ptr.vmem [resolvable:$true] %s1126_s25 }
  0x1b   :  { %1392 = vset.pattern.permute.xlu1 %v1567_v62  ;;  %1339 = vmatprep.subr.mxu0 %v748_v61  ;;  %v742_v10 = vld [vmem:[%s2268_s7 + $0x28] sm:$0xff]  ;;  %v741_v12 = vld [vmem:[%s2268_s7 + $0x20] sm:$0xff]  ;;  %v627_v13 = vld [vmem:[%s2267_s6 + $0x58] sm:$0xff]  ;;  %s1542_s27 = scalar_lea.vmem %s1127_s25, 16  ;;  %s1546_s28 = scalar_lea.vmem %s1127_s25, 32 }
  0x1c   :  { %398 = vperm.xlu1 %1392, %v1623_v1   ;;  %1406 = vset.pattern.permute.xlu0 %v1567_v62  ;;  %v740_v14 = vld [vmem:[%s2268_s7 + $0x18] sm:$0xff]  ;;  %v626_v16 = vld [vmem:[%s2267_s6 + $0x50] sm:$0xff]  ;;  %v738_v19 = vld [vmem:[%s2268_s7 + $0x8] sm:$0xff]  ;;  %p1543_p0 = scmp.ne.s32.totalorder %s1127_s25, %s1542_s27  ;;  %p1547_p1 = scmp.lt.s32.totalorder %s1127_s25, %s1127_s25 }
  0x1d   :  { %416 = vperm.xlu0 %1406, %v1725_v35   ;;  %1340 = vmatpush3.msra.mxu0 %v748_v61  ;;  %v739_v17 = vld [vmem:[%s2268_s7 + $0x10] sm:$0xff]  ;;  %v625_v20 = vld [vmem:[%s2267_s6 + $0x48] sm:$0xff]  ;;  %v737_v21 = vld [vmem:[%s2268_s7] sm:$0xff]  ;;  %p1548_p2 = scmp.lt.s32.totalorder %s1546_s28, %s1542_s27 }
  0x1e   :  { %1341 = vmatprep.subr.mxu0 %v747_v63  ;;  %1290 = vmatpush3.msra.mxu1 %v630_v60  ;;  %v624_v22 = vld [vmem:[%s2267_s6 + $0x40] sm:$0xff]  ;;  %v623_v24 = vld [vmem:[%s2267_s6 + $0x38] sm:$0xff]  ;;  %v622_v25 = vld [vmem:[%s2267_s6 + $0x30] sm:$0xff] }
  0x1f   :  { %1342 = vmatpush3.msra.mxu0 %v747_v63  ;;  %1291 = vmatprep.subr.mxu1 %v629_v0  ;;  %v621_v27 = vld [vmem:[%s2267_s6 + $0x28] sm:$0xff]  ;;  %v620_v28 = vld [vmem:[%s2267_s6 + $0x20] sm:$0xff]  ;;  %v619_v29 = vld [vmem:[%s2267_s6 + $0x18] sm:$0xff]  ;;  %p1549_p3 = por %p1548_p2, %p1547_p1 }
  0x20   :  { %401 = vperm.xlu1 %1392, %v1640_v6   ;;  %1343 = vmatprep.subr.mxu0 %v746_v2  ;;  %v618_v31 = vld [vmem:[%s2267_s6 + $0x10] sm:$0xff]  ;;  %v617_v32 = vld [vmem:[%s2267_s6 + $0x8] sm:$0xff]  ;;  %v616_v34 = vld [vmem:[%s2267_s6] sm:$0xff] }
  0x21   :  { %1407 = vset.pattern.permute.xlu0 %v1566_v58  ;;  %1344 = vmatpush3.msra.mxu0 %v746_v2  ;;  %p1550_p4 = pnand %p1549_p3, %p1543_p0 }
  0x22   :  { %345 = vperm.xlu0 %1407, %v1640_v6   ;;  %1345 = vmatprep.subr.mxu0 %v745_v3 }
  0x23   :  { %1346 = vmatpush3.msra.mxu0 %v745_v3  ;;  %1292 = vmatpush3.msra.mxu1 %v629_v0 }
  0x24   :  { %1393 = vset.pattern.permute.xlu1 %v1566_v58  ;;  %1347 = vmatprep.subr.mxu0 %v744_v4 }
  0x25   :  { %348 = vperm.xlu1 %1393, %v1634_v5   ;;  %1348 = vmatpush3.msra.mxu0 %v744_v4 }
  0x26   :  { %1349 = vmatprep.subr.mxu0 %v743_v7  ;;  %354 = vperm.xlu0 %1407, %v1702_v26  }
  0x27   :  { %1350 = vmatpush3.msra.mxu0 %v743_v7  ;;  %1293 = vmatprep.subr.mxu1 %v628_v9 }
  0x28   :  { %1351 = vmatprep.subr.mxu0 %v742_v10  ;;  %1294 = vmatpush3.msra.mxu1 %v628_v9 }
  0x29   :  { %1394 = vset.pattern.permute.xlu1 %v1567_v62  ;;  %1352 = vmatpush3.msra.mxu0 %v742_v10 }
  0x2a   :  { %404 = vperm.xlu1 %1394, %v1634_v5   ;;  %1353 = vmatprep.subr.mxu0 %v741_v12 }
  0x2b   :  { %1354 = vmatpush3.msra.mxu0 %v741_v12  ;;  %1295 = vmatprep.subr.mxu1 %v627_v13 }
  0x2c   :  { %1355 = vmatprep.subr.mxu0 %v740_v14  ;;  %1296 = vmatpush3.msra.mxu1 %v627_v13 }
  0x2d   :  { %1356 = vmatpush3.msra.mxu0 %v740_v14  ;;  %1297 = vmatprep.subr.mxu1 %v626_v16 }
  0x2e   :  { %1395 = vset.pattern.permute.xlu1 %v1565_v56  ;;  %1357 = vmatprep.subr.mxu0 %v739_v17 }
  0x2f   :  { %454 = vperm.xlu1 %1395, %v1623_v1   ;;  %1358 = vmatpush3.msra.mxu0 %v739_v17 }
  0x30   :  { %1359 = vmatprep.subr.mxu0 %v738_v19  ;;  %1298 = vmatpush3.msra.mxu1 %v626_v16 }
  0x31   :  { %1360 = vmatpush3.msra.mxu0 %v738_v19  ;;  %1299 = vmatprep.subr.mxu1 %v625_v20 }
  0x32   :  { %1361 = vmatprep.subr.mxu0 %v737_v21  ;;  %1300 = vmatpush3.msra.mxu1 %v625_v20 }
  0x33   :  { %457 = vperm.xlu1 %1395, %v1640_v6   ;;  %1362 = vmatpush3.msra.mxu0 %v737_v21 }
  0x34   :  { %1301 = vmatprep.subr.mxu1 %v624_v22 }
  0x35   :  { %1302 = vmatpush3.msra.mxu1 %v624_v22 }
  0x36   :  { %1303 = vmatprep.subr.mxu1 %v623_v24 }
  0x37   :  { %1396 = vset.pattern.permute.xlu1 %v1566_v58  ;;  %1304 = vmatpush3.msra.mxu1 %v623_v24 }
  0x38   :  { %351 = vperm.xlu1 %1396, %v1672_v15   ;;  %1305 = vmatprep.subr.mxu1 %v622_v25 }
  0x39   :  { %1306 = vmatpush3.msra.mxu1 %v622_v25 }
  0x3a   :  { %1307 = vmatprep.subr.mxu1 %v621_v27 }
  0x3b   :  { %1308 = vmatpush3.msra.mxu1 %v621_v27 }
  0x3c   :  { %1397 = vset.pattern.permute.xlu1 %v1567_v62  ;;  %1309 = vmatprep.subr.mxu1 %v620_v28 }
  0x3d   :  { %407 = vperm.xlu1 %1397, %v1672_v15   ;;  %1310 = vmatpush3.msra.mxu1 %v620_v28 }
  0x3e   :  { %1311 = vmatprep.subr.mxu1 %v619_v29 }
  0x3f   :  { %1312 = vmatpush3.msra.mxu1 %v619_v29 }
  0x40   :  { %1313 = vmatprep.subr.mxu1 %v618_v31 }
  0x41   :  { %1399 = vset.pattern.permute.xlu1 %v1568_v33  ;;  %1314 = vmatpush3.msra.mxu1 %v618_v31 }
  0x42   :  { %510 = vperm.xlu1 %1399, %v1623_v1   ;;  %1315 = vmatprep.subr.mxu1 %v617_v32  ;;  %v283_v1 = vlaneseq }
  0x43   :  { %1316 = vmatpush3.msra.mxu1 %v617_v32  ;;  %v1134_v32 = vld [vmem:[%s2266_s5] ss:$0 sm:$0xff] }
  0x44   :  { %1317 = vmatprep.subr.mxu1 %v616_v34 }
  0x45   :  { %1318 = vmatpush3.msra.mxu1 %v616_v34 }
  0x46   :  { %513 = vperm.xlu1 %1399, %v1640_v6   ;;  %v1909_v6 = vand.u32 127, %v283_v1 }
  0x4a   :  { %1400 = vset.pattern.permute.xlu1 %v1567_v62 }
  0x4b   :  { %410 = vperm.xlu1 %1400, %v1702_v26  }
  0x4f   :  { %1401 = vset.pattern.permute.xlu1 %v1565_v56 }
  0x50   :  { %463 = vperm.xlu1 %1401, %v1672_v15  }
  0x54   :  { %1402 = vset.pattern.permute.xlu1 %v1566_v58 }
  0x55   :  { %357 = vperm.xlu1 %1402, %v1712_v30  }
  0x59   :  { %1403 = vset.pattern.permute.xlu1 %v1567_v62 }
  0x5a   :  { %413 = vperm.xlu1 %1403, %v1712_v30  }
  0x5e   :  { %1404 = vset.pattern.permute.xlu1 %v1568_v33 }
  0x5f   :  { %519 = vperm.xlu1 %1404, %v1672_v15  }
  0x63   :  { %1405 = vset.pattern.permute.xlu1 %v1566_v58 }
  0x64   :  { %360 = vperm.xlu1 %1405, %v1725_v35  }
  0x68   :  { %1408 = vset.pattern.permute.xlu1 %v1565_v56 }
  0x69   :  { %469 = vperm.xlu1 %1408, %v1712_v30  }
  0x6d   :  { %1409 = vset.pattern.permute.xlu1 %v1568_v33 }
  0x6e   :  { %522 = vperm.xlu1 %1409, %v1702_v26  }
  0x72   :  { %1411 = vset.pattern.permute.xlu1 %v1567_v62 }
  0x7d   :  { %v295_v36 = vpop.permute.xlu0 %294 }
  0x7e   :  { %vm317_vm1 = vcmp.eq.s32.totalorder %v1909_v6, %v295_v36  ;;  %v301_v15 = vpop.permute.xlu1 %300 }
  0x7f   :  { %1363 = vmatprep.mubr.msk.f32.mxu0 %vm317_vm1, %v1569_v37  ;;  %1319 = vmatprep.mubr.msk.f32.mxu1 %vm317_vm1, %v1569_v37  ;;  %vm319_vm2 = vcmp.eq.s32.totalorder %v1909_v6, %v301_v15 }
  0x81   :  { %v298_v38 = vpop.permute.xlu0 %297 }
  0x82   :  { %vm318_vm3 = vcmp.eq.s32.totalorder %v1909_v6, %v298_v38  ;;  %v304_v26 = vpop.permute.xlu1 %303 }
  0x83   :  { %1364 = vmatmul.mubr.msk.f32.vlgmr.msra.gmra.mxu0 %vm318_vm3, %v1569_v37  ;;  %1320 = vmatmul.mubr.msk.f32.vlgmr.msra.gmra.mxu1 %vm318_vm3, %v1569_v37  ;;  %vm320_vm4 = vcmp.eq.s32.totalorder %v1909_v6, %v304_v26 }
  0x84   :  { %1366 = vmatprep.mubr.msk.f32.mxu0 %vm319_vm2, %v1569_v37  ;;  %1322 = vmatprep.mubr.msk.f32.mxu1 %vm319_vm2, %v1569_v37 }
  0x85   :  { %v307_v39 = vpop.permute.xlu0 %306 }
  0x86   :  { %vm321_vm5 = vcmp.eq.s32.totalorder %v1909_v6, %v307_v39 }
  0x87   :  { %1367 = vmatmul.mubr.msk.f32.gmra.mxu0 %vm320_vm4, %v1569_v37  ;;  %1323 = vmatmul.mubr.msk.f32.gmra.mxu1 %vm320_vm4, %v1569_v37  ;;  %v310_v40 = vpop.permute.xlu1 %309 }
  0x88   :  { %1369 = vmatprep.mubr.msk.f32.mxu0 %vm321_vm5, %v1569_v37  ;;  %1325 = vmatprep.mubr.msk.f32.mxu1 %vm321_vm5, %v1569_v37  ;;  %vm322_vm6 = vcmp.eq.s32.totalorder %v1909_v6, %v310_v40 }
  0x89   :  { %v313_v41 = vpop.permute.xlu0 %312 }
  0x8a   :  { %vm323_vm7 = vcmp.eq.s32.totalorder %v1909_v6, %v313_v41 }
  0x8b   :  { %1370 = vmatmul.mubr.msk.f32.gmra.mxu0 %vm322_vm6, %v1569_v37  ;;  %1326 = vmatmul.mubr.msk.f32.gmra.mxu1 %vm322_vm6, %v1569_v37 }
  0x8c   :  { %v316_v42 = vpop.permute.xlu1 %315  ;;  %1372 = vmatprep.mubr.msk.f32.mxu0 %vm323_vm7, %v1569_v37  ;;  %1328 = vmatprep.mubr.msk.f32.mxu1 %vm323_vm7, %v1569_v37 }
  0x8d   :  { %vm324_vm8 = vcmp.eq.s32.totalorder %v1909_v6, %v316_v42 }
  0x8e   :  { %v461_v43 = vpop.permute.xlu0 %460 }
  0x8f   :  { %1373 = vmatmul.mubr.msk.f32.gmra.mxu0 %vm324_vm8, %v1569_v37  ;;  %1329 = vmatmul.mubr.msk.f32.gmra.mxu1 %vm324_vm8, %v1569_v37  ;;  %vm479_vm14 = vcmp.eq.s32.totalorder %v1909_v6, %v461_v43 }
  0x90   :  { %v1169_v63 = vsel %vm479_vm14, 1.0, %v1570_v46 }
  0x91   :  { %v343_v44 = vpop.permute.xlu1 %342 }
  0x92   :  { %vm365_vm9 = vcmp.eq.s32.totalorder %v1909_v6, %v343_v44 }
  0x93   :  { %v467_v45 = vpop.permute.xlu0 %466  ;;  %v1151_v47 = vsel %vm365_vm9, 1.0, %v1570_v46 }
  0x94   :  { %vm481_vm8 = vcmp.eq.s32.totalorder %v1909_v6, %v467_v45 }
  0x95   :  { %v1171_v34 = vsel %vm481_vm8, 1.0, %v1570_v46 }
  0x97   :  { %v399_v48 = vpop.permute.xlu1 %398 }
  0x98   :  { %vm421_vm10 = vcmp.eq.s32.totalorder %v1909_v6, %v399_v48  ;;  %v1922_v49 = vpop.permute.xlu0 %416 }
  0x99   :  { %v1159_v51 = vsel %vm421_vm10, 1.0, %v1570_v46  ;;  %vm427_vm14 = vcmp.eq.s32.totalorder %v1909_v6, %v1922_v49 }
  0x9a   :  { %v445_v52 = vadd.f32 %v1159_v51, %v1151_v47 }
  0x9b   :  { %v402_v53 = vpop.permute.xlu1 %401 }
  0x9c   :  { %vm422_vm11 = vcmp.eq.s32.totalorder %v1909_v6, %v402_v53 }
  0x9d   :  { %v1160_v54 = vsel %vm422_vm11, 1.0, %v1570_v46  ;;  %v346_v55 = vpop.permute.xlu0 %345 }
  0x9e   :  { %vm366_vm12 = vcmp.eq.s32.totalorder %v1909_v6, %v346_v55 }
  0x9f   :  { %v1152_v57 = vsel %vm366_vm12, 1.0, %v1570_v46 }
  0xa0   :  { %v349_v58 = vpop.permute.xlu1 %348  ;;  %v446_v59 = vadd.f32 %v1160_v54, %v1152_v57 }
  0xa1   :  { %vm367_vm13 = vcmp.eq.s32.totalorder %v1909_v6, %v349_v58  ;;  %v355_v24 = vpop.permute.xlu0 %354 }
  0xa2   :  { %v1153_v60 = vsel %vm367_vm13, 1.0, %v1570_v46  ;;  %vm369_vm7 = vcmp.eq.s32.totalorder %v1909_v6, %v355_v24 }
  0xa3   :  { %v1155_v31 = vsel %vm369_vm7, 1.0, %v1570_v46 }
  0xa5   :  { %v405_v61 = vpop.permute.xlu1 %404 }
  0xa6   :  { %vm423_vm15 = vcmp.eq.s32.totalorder %v1909_v6, %v405_v61 }
  0xa7   :  { %v1161_v62 = vsel %vm423_vm15, 1.0, %v1570_v46 }
  0xa8   :  { %v447_v0 = vadd.f32 %v1161_v62, %v1153_v60 }
  0xaa   :  { %v455_v2 = vpop.permute.xlu1 %454  ;;  %v1935_v3 = vadd.f32 %v1169_v63, %v447_v0 }
  0xab   :  { %vm477_vm1 = vcmp.eq.s32.totalorder %v1909_v6, %v455_v2 }
  0xac   :  { %v1167_v4 = vsel %vm477_vm1, 1.0, %v1570_v46 }
  0xad   :  { %v501_v7 = vadd.f32 %v1167_v4, %v445_v52 }
  0xae   :  { %v458_v9 = vpop.permute.xlu1 %457 }
  0xaf   :  { %vm478_vm2 = vcmp.eq.s32.totalorder %v1909_v6, %v458_v9 }
  0xb0   :  { %v1168_v10 = vsel %vm478_vm2, 1.0, %v1570_v46 }
  0xb1   :  { %v502_v12 = vadd.f32 %v1168_v10, %v446_v59 }
  0xb3   :  { %v352_v13 = vpop.permute.xlu1 %351 }
  0xb4   :  { %vm368_vm3 = vcmp.eq.s32.totalorder %v1909_v6, %v352_v13 }
  0xb5   :  { %v1154_v14 = vsel %vm368_vm3, 1.0, %v1570_v46 }
  0xb8   :  { %v408_v16 = vpop.permute.xlu1 %407 }
  0xb9   :  { %vm424_vm4 = vcmp.eq.s32.totalorder %v1909_v6, %v408_v16 }
  0xba   :  { %v1162_v17 = vsel %vm424_vm4, 1.0, %v1570_v46 }
  0xbb   :  { %v448_v19 = vadd.f32 %v1162_v17, %v1154_v14 }
  0xbd   :  { %v511_v20 = vpop.permute.xlu1 %510 }
  0xbe   :  { %vm533_vm5 = vcmp.eq.s32.totalorder %v1909_v6, %v511_v20 }
  0xbf   :  { %v1175_v21 = vsel %vm533_vm5, 1.0, %v1570_v46 }
  0xc0   :  { %v1947_v22 = vadd.f32 %v1175_v21, %v501_v7  ;;  %v1165_v7 = vsel %vm427_vm14, 1.0, %v1570_v46  ;;  %vm589_vm14 = vcmask 7168  }
  0xc1   :  { %v514_v25 = vpop.permute.xlu1 %513 }
  0xc2   :  { %vm534_vm6 = vcmp.eq.s32.totalorder %v1909_v6, %v514_v25 }
  0xc3   :  { %v1176_v27 = vsel %vm534_vm6, 1.0, %v1570_v46 }
  0xc4   :  { %v1952_v28 = vadd.f32 %v1176_v27, %v502_v12 }
  0xc6   :  { %v411_v29 = vpop.permute.xlu1 %410 }
  0xc7   :  { %vm425_vm9 = vcmp.eq.s32.totalorder %v1909_v6, %v411_v29 }
  0xc8   :  { %v1163_v1 = vsel %vm425_vm9, 1.0, %v1570_v46 }
  0xc9   :  { %v449_v36 = vadd.f32 %v1163_v1, %v1155_v31 }
  0xcb   :  { %v1277_v15 = vpop.f32.mrf.mxu0  ;;  %v464_v38 = vpop.permute.xlu1 %463  ;;  %v1962_v26 = vadd.f32 %v1171_v34, %v449_v36 }
  0xcc   :  { %v178_v37 = vadd.f32 %v1277_v15, %v1134_v32  ;;  %vm480_vm10 = vcmp.eq.s32.totalorder %v1909_v6, %v464_v38 }
  0xcd   :  { %v172_v39 = vpop.f32.mrf.mxu0  ;;  %v1170_v41 = vsel %vm480_vm10, 1.0, %v1570_v46 }
  0xce   :  { %v173_v40 = vadd.f32 %v1134_v32, %v172_v39  ;;  %213 = vmax.xlane.f32.xlu1 %v178_v37  ;;  %v504_v43 = vadd.f32 %v1170_v41, %v448_v19 }
  0xcf   :  { %v1280_v42 = vpop.f32.mrf.mxu0 }
  0xd0   :  { %v188_v44 = vadd.f32 %v1280_v42, %v1134_v32  ;;  %211 = vmax.xlane.f32.xlu0 %v173_v40  ;;  %v358_v47 = vpop.permute.xlu1 %357 }
  0xd1   :  { %v182_v45 = vpop.f32.mrf.mxu0  ;;  %vm370_vm11 = vcmp.eq.s32.totalorder %v1909_v6, %v358_v47 }
  0xd2   :  { %v1967_v52 = vadd.f32 %v1134_v32, %v182_v45  ;;  %v1156_v54 = vsel %vm370_vm11, 1.0, %v1570_v46 }
  0xd3   :  { %v1283_v48 = vpop.f32.mrf.mxu0 }
  0xd4   :  { %217 = vmax.xlane.f32.xlu0 %v188_v44  ;;  %v198_v61 = vadd.f32 %v1283_v48, %v1134_v32 }
  0xd5   :  { %v192_v51 = vpop.f32.mrf.mxu0  ;;  %v414_v55 = vpop.permute.xlu1 %413 }
  0xd6   :  { %v193_v53 = vadd.f32 %v1134_v32, %v192_v51  ;;  %vm426_vm12 = vcmp.eq.s32.totalorder %v1909_v6, %v414_v55 }
  0xd7   :  { %v1286_v57 = vpop.f32.mrf.mxu0  ;;  %v1164_v58 = vsel %vm426_vm12, 1.0, %v1570_v46 }
  0xd8   :  { %219 = vmax.xlane.f32.xlu1 %v193_v53  ;;  %215 = vmax.xlane.f32.xlu0 %v1967_v52  ;;  %v450_v60 = vadd.f32 %v1164_v58, %v1156_v54  ;;  %v1980_v2 = vadd.f32 %v1286_v57, %v1134_v32 }
  0xd9   :  { %v202_v59 = vpop.f32.mrf.mxu0 }
  0xda   :  { %v1973_v62 = vadd.f32 %v1134_v32, %v202_v59  ;;  %v520_v63 = vpop.permute.xlu1 %519 }
  0xdb   :  { %vm536_vm13 = vcmp.eq.s32.totalorder %v1909_v6, %v520_v63 }
  0xdc   :  { %223 = vmax.xlane.f32.xlu1 %v1973_v62  ;;  %221 = vmax.xlane.f32.xlu0 %v198_v61  ;;  %v1178_v0 = vsel %vm536_vm13, 1.0, %v1570_v46 }
  0xdd   :  { %v560_v4 = vadd.f32 %v1178_v0, %v504_v43 }
  0xdf   :  { %v361_v9 = vpop.permute.xlu1 %360 }
  0xe0   :  { %225 = vmax.xlane.f32.xlu0 %v1980_v2  ;;  %vm371_vm15 = vcmp.eq.s32.totalorder %v1909_v6, %v361_v9 }
  0xe1   :  { %v1157_v10 = vsel %vm371_vm15, 1.0, %v1570_v46 }
  0xe2   :  { %v1986_v12 = vadd.f32 %v1165_v7, %v1157_v10 }
  0xe4   :  { %v470_v13 = vpop.permute.xlu1 %469 }
  0xe5   :  { %vm482_vm1 = vcmp.eq.s32.totalorder %v1909_v6, %v470_v13 }
  0xe6   :  { %v1172_v49 = vsel %vm482_vm1, 1.0, %v1570_v46 }
  0xe7   :  { %v1990_v14 = vadd.f32 %v1172_v49, %v450_v60 }
  0xe9   :  { %v523_v16 = vpop.permute.xlu1 %522 }
  0xea   :  { %vm537_vm2 = vcmp.eq.s32.totalorder %v1909_v6, %v523_v16 }
  0xeb   :  { %v1179_v32 = vsel %vm537_vm2, 1.0, %v1570_v46 }
  0xed   :  { %419 = vperm.xlu1 %1411, %v1763_v50  }
  0xf1   :  { %1412 = vset.pattern.permute.xlu1 %v1565_v56 }
  0xf2   :  { %472 = vperm.xlu1 %1412, %v1725_v35  }
  0xf6   :  { %363 = vperm.xlu0 %1407, %v1763_v50   ;;  %475 = vperm.xlu1 %1412, %v1763_v50  }
  0xfa   :  { %1410 = vset.pattern.permute.xlu0 %v1568_v33  ;;  %1413 = vset.pattern.permute.xlu1 %v1568_v33 }
  0xfb   :  { %516 = vperm.xlu0 %1410, %v1634_v5  }
  0xff   :  { %525 = vperm.xlu0 %1410, %v1712_v30  }
 0x157   :  { %v214_v17 = vpop.xlane.xlu1 %213 }
 0x158   :  { %v228_v19 = vsub.f32 %v178_v37, %v214_v17 }
 0x159   :  { %v212_v20 = vpop.xlane.xlu0 %211 }
 0x15a   :  { %v237_v21 = vmul.f32 1.442695, %v228_v19  ;;  %v566_v56 = vmul.f32 %v1952_v28, %v228_v19  ;;  %v227_v24 = vsub.f32 %v173_v40, %v212_v20  ;;  %v561_v28 = vadd.f32 %v1179_v32, %v1962_v26 }
 0x15c   :  { %1414 = vpow2.f32 %v237_v21  ;;  %v235_v25 = vmul.f32 1.442695, %v227_v24  ;;  %v565_v29 = vmul.f32 %v1947_v22, %v227_v24 }
 0x15d   :  { %v218_v27 = vpop.xlane.xlu0 %217 }
 0x15e   :  { %1416 = vpow2.f32 %v235_v25  ;;  %v573_v33 = vadd.f32 %v566_v56, %v565_v29  ;;  %v230_v5 = vsub.f32 %v188_v44, %v218_v27 }
 0x160   :  { %v568_v34 = vmul.f32 %v560_v4, %v230_v5  ;;  %v241_v1 = vmul.f32 1.442695, %v230_v5 }
 0x161   :  { %v216_v31 = vpop.xlane.xlu0 %215  ;;  %v220_v30 = vpop.xlane.xlu1 %219 }
 0x162   :  { %v231_v36 = vsub.f32 %v193_v53, %v220_v30  ;;  %1418 = vpow2.f32 %v241_v1  ;;  %v229_v22 = vsub.f32 %v1967_v52, %v216_v31 }
 0x164   :  { %v569_v38 = vmul.f32 %v561_v28, %v231_v36  ;;  %v239_v41 = vmul.f32 1.442695, %v229_v22  ;;  %v243_v44 = vmul.f32 1.442695, %v231_v36 }
 0x165   :  { %v222_v15 = vpop.xlane.xlu0 %221  ;;  %v224_v40 = vpop.xlane.xlu1 %223 }
 0x166   :  { %v232_v42 = vsub.f32 %v198_v61, %v222_v15  ;;  %1420 = vpow2.f32 %v239_v41  ;;  %v2008_v45 = vsub.f32 %v1973_v62, %v224_v40 }
 0x167   :  { %1422 = vpow2.f32 %v243_v44 }
 0x168   :  { %v245_v47 = vmul.f32 1.442695, %v232_v42  ;;  %v247_v48 = vmul.f32 1.442695, %v2008_v45 }
 0x169   :  { %v1415_v37 = vpop.eup %1414  ;;  %v226_v43 = vpop.xlane.xlu0 %225 }
 0x16a   :  { %253 = vadd.xlane.f32.xlu0 %v1415_v37  ;;  %1424 = vpow2.f32 %v245_v47  ;;  %v2014_v53 = vsub.f32 %v1980_v2, %v226_v43 }
 0x16b   :  { %v1417_v39 = vpop.eup %1416  ;;  %1426 = vpow2.f32 %v247_v48 }
 0x16c   :  { %251 = vadd.xlane.f32.xlu1 %v1417_v39  ;;  %v249_v55 = vmul.f32 1.442695, %v2014_v53 }
 0x16e   :  { %1428 = vpow2.f32 %v249_v55 }
 0x16f   :  { %v1419_v51 = vpop.eup %1418 }
 0x170   :  { %257 = vadd.xlane.f32.xlu0 %v1419_v51 }
 0x171   :  { %v2010_v26 = vpop.permute.xlu0 %363 }
 0x172   :  { %vm372_vm2 = vcmp.eq.s32.totalorder %v1909_v6, %v2010_v26 }
 0x173   :  { %v1421_v54 = vpop.eup %1420 }
 0x174   :  { %255 = vadd.xlane.f32.xlu1 %v1421_v54  ;;  %v1423_v58 = vpop.eup %1422 }
 0x176   :  { %v517_v52 = vpop.permute.xlu0 %516 }
 0x177   :  { %vm535_vm3 = vcmp.eq.s32.totalorder %v1909_v6, %v517_v52  ;;  %v1425_v62 = vpop.eup %1424 }
 0x178   :  { %v1177_v59 = vsel %vm535_vm3, 1.0, %v1570_v46  ;;  %259 = vadd.xlane.f32.xlu1 %v1423_v58  ;;  %v1427_v0 = vpop.eup %1426  ;;  %261 = vadd.xlane.f32.xlu0 %v1425_v62 }
 0x179   :  { %v559_v60 = vadd.f32 %v1177_v59, %v1935_v3  ;;  %v2027_v3 = vpop.f32.mrf.mxu0 }
 0x17a   :  { %v526_v57 = vpop.permute.xlu0 %525 }
 0x17b   :  { %vm538_vm4 = vcmp.eq.s32.totalorder %v1909_v6, %v526_v57  ;;  %v567_v2 = vmul.f32 %v559_v60, %v229_v22  ;;  %v1429_v49 = vpop.eup %1428  ;;  %v2029_v16 = vpop.f32.mrf.mxu0 }
 0x17c   :  { %v1180_v61 = vsel %vm538_vm4, 1.0, %v1570_v46  ;;  %263 = vadd.xlane.f32.xlu1 %v1427_v0  ;;  %265 = vadd.xlane.f32.xlu0 %v1429_v49  ;;  %v866_v19 = vand.u32 2147483647, %v2029_v16 }
 0x17d   :  { %v562_v63 = vadd.f32 %v1180_v61, %v1990_v14  ;;  %v574_v7 = vadd.f32 %v573_v33, %v567_v2  ;;  %v867_v14 = vand.u32 2147483647, %v2027_v3  ;;  %v2032_v17 = vpop.f32.mrf.mxu0 }
 0x17e   :  { %v874_v56 = vsub.f32 0.0, %v866_v19 }
 0x17f   :  { %v570_v4 = vmul.f32 %v562_v63, %v232_v42  ;;  %v575_v9 = vadd.f32 %v574_v7, %v568_v34  ;;  %v875_v20 = vsub.f32 0.0, %v867_v14  ;;  %v2035_v21 = vpop.f32.mrf.mxu0 }
 0x180   :  { %v868_v24 = vand.u32 2147483647, %v2035_v21  ;;  %v882_v27 = vmul.f32 1.442695, %v874_v56 }
 0x181   :  { %v576_v10 = vadd.f32 %v575_v9, %v569_v38  ;;  %v884_v25 = vmul.f32 1.442695, %v875_v20 }
 0x182   :  { %v876_v29 = vsub.f32 0.0, %v868_v24 }
 0x183   :  { %v2023_v13 = vadd.f32 %v576_v10, %v570_v4  ;;  %1430 = vpow2.f32 %v884_v25 }
 0x184   :  { %1432 = vpow2.f32 %v882_v27  ;;  %v886_v31 = vmul.f32 1.442695, %v876_v29 }
 0x186   :  { %1434 = vpow2.f32 %v886_v31 }
 0x18d   :  { %528 = vperm.xlu1 %1413, %v1725_v35   ;;  %v2038_v35 = vpop.f32.mrf.mxu0 }
 0x18e   :  { %v871_v32 = vand.u32 2147483647, %v2038_v35 }
 0x18f   :  { %v2041_v33 = vpop.f32.mrf.mxu0 }
 0x190   :  { %v870_v30 = vand.u32 2147483647, %v2041_v33  ;;  %v879_v28 = vsub.f32 0.0, %v871_v32  ;;  %v1431_v22 = vpop.eup %1430 }
 0x191   :  { %v2045_v34 = vpop.f32.mrf.mxu0  ;;  %v1433_v40 = vpop.eup %1432  ;;  %v907_v42 = vadd.f32 1.0, %v1431_v22  ;;  %v910_v59 = vmul.f32 -0.5, %v1431_v22  ;;  %v913_v4 = vand.u32 2147483647, %v1431_v22 }
 0x192   :  { %531 = vperm.xlu0 %1410, %v1763_v50   ;;  %v869_v50 = vand.u32 2147483647, %v2032_v17  ;;  %v878_v36 = vsub.f32 0.0, %v870_v30  ;;  %v892_v39 = vmul.f32 1.442695, %v879_v28  ;;  %v898_v44 = vadd.f32 1.0, %v1433_v40 }
 0x193   :  { %v2047_v15 = vpop.f32.mrf.mxu0  ;;  %v873_v43 = vand.u32 2147483647, %v2045_v34  ;;  %v1435_v48 = vpop.eup %1434  ;;  %v901_v61 = vmul.f32 -0.5, %v1433_v40  ;;  %v911_v63 = vadd.f32 1.0, %v910_v59  ;;  %v904_v49 = vand.u32 2147483647, %v1433_v40 }
 0x194   :  { %v877_v5 = vsub.f32 0.0, %v869_v50  ;;  %v890_v37 = vmul.f32 1.442695, %v878_v36  ;;  %v872_v38 = vand.u32 2147483647, %v2047_v15  ;;  %v916_v54 = vadd.f32 1.0, %v1435_v48 }
 0x195   :  { %v881_v51 = vsub.f32 0.0, %v873_v43  ;;  %v902_v7 = vadd.f32 1.0, %v901_v61  ;;  %v919_v9 = vmul.f32 -0.5, %v1435_v48  ;;  %v912_v20 = vmul.f32 %v1431_v22, %v911_v63 }
 0x196   :  { %v888_v1 = vmul.f32 1.442695, %v877_v5  ;;  %v880_v41 = vsub.f32 0.0, %v872_v38  ;;  %vm2061_vm5 = vcmp.lt.f32.partialorder %v913_v4, 0.0004427343 }
 0x197   :  { %v896_v55 = vmul.f32 1.442695, %v881_v51  ;;  %v920_v50 = vadd.f32 1.0, %v919_v9  ;;  %vm2066_vm6 = vcmp.lt.f32.partialorder %v904_v49, 0.0004427343 }
 0x198   :  { %1436 = vpow2.f32 %v888_v1  ;;  %v894_v47 = vmul.f32 1.442695, %v880_v41  ;;  %v922_v30 = vand.u32 2147483647, %v1435_v48  ;;  %v858_v1 = vmax.f32 %v2029_v16, 0.0 }
 0x199   :  { %1438 = vpow2.f32 %v890_v37  ;;  %v921_v38 = vmul.f32 %v1435_v48, %v920_v50  ;;  %v860_v48 = vmax.f32 %v2035_v21, 0.0  ;;  %v861_v21 = vmax.f32 %v2032_v17, 0.0 }
 0x19a   :  { %1440 = vpow2.f32 %v892_v39  ;;  %vm2082_vm7 = vcmp.lt.f32.partialorder %v922_v30, 0.0004427343 }
 0x19b   :  { %1442 = vlog2.f32 %v907_v42 }
 0x19c   :  { %1444 = vlog2.f32 %v898_v44 }
 0x19d   :  { %1446 = vpow2.f32 %v894_v47 }
 0x19e   :  { %1448 = vlog2.f32 %v916_v54 }
 0x19f   :  { %1450 = vpow2.f32 %v896_v55  ;;  %v2095_v55 = vld [vmem:[%s2262_s1 + $0x20] sm:$0xff] }
 0x1a5   :  { %v1437_v52 = vpop.eup %1436 }
 0x1a6   :  { %v925_v57 = vadd.f32 1.0, %v1437_v52  ;;  %v2051_v58 = vpop.eup %1438  ;;  %v928_v24 = vmul.f32 -0.5, %v1437_v52  ;;  %v931_v37 = vand.u32 2147483647, %v1437_v52 }
 0x1a7   :  { %v2053_v60 = vpop.eup %1440  ;;  %v934_v62 = vadd.f32 1.0, %v2051_v58  ;;  %v940_v63 = vand.u32 2147483647, %v2051_v58 }
 0x1a8   :  { %1452 = vlog2.f32 %v925_v57  ;;  %v943_v0 = vadd.f32 1.0, %v2053_v60  ;;  %v1443_v2 = vpop.eup %1442  ;;  %v946_v39 = vmul.f32 -0.5, %v2053_v60  ;;  %vm2087_vm8 = vcmp.lt.f32.partialorder %v931_v37, 0.0004427343 }
 0x1a9   :  { %1454 = vrcp.f32 %v1648_v8  ;;  %v1445_v10 = vpop.eup %1444  ;;  %v909_v19 = vmul.f32 0.6931472, %v1443_v2  ;;  %v903_v8 = vmul.f32 %v1433_v40, %v902_v7  ;;  %v937_v40 = vmul.f32 -0.5, %v2051_v58  ;;  %v1321_v2 = vpop.f32.mrf.mxu1 }
 0x1aa   :  { %1456 = vrcp.f32 %v1659_v11  ;;  %v2059_v14 = vpop.eup %1446  ;;  %v900_v25 = vmul.f32 0.6931472, %v1445_v10  ;;  %v859_v11 = vmax.f32 %v2027_v3, 0.0  ;;  %v929_v3 = vadd.f32 1.0, %v928_v24 }
 0x1ab   :  { %1458 = vlog2.f32 %v934_v62  ;;  %v952_v29 = vadd.f32 1.0, %v2059_v14  ;;  %v1449_v5 = vpop.eup %1448  ;;  %v915_v31 = vsel %vm2061_vm5, %v912_v20, %v909_v19  ;;  %v947_v51 = vadd.f32 1.0, %v946_v39  ;;  %v2103_v62 = vld [vmem:[%s2262_s1 + $0x28] sm:$0xff] }
 0x1ac   :  { %1460 = vlog2.f32 %v943_v0  ;;  %v2074_v32 = vpop.eup %1450  ;;  %v906_v28 = vsel %vm2066_vm6, %v903_v8, %v900_v25  ;;  %v918_v22 = vmul.f32 0.6931472, %v1449_v5  ;;  %v930_v42 = vmul.f32 %v1437_v52, %v929_v3  ;;  %v2108_v0 = vpop.permute.xlu1 %419 }
 0x1ad   :  { %1462 = vrcp.f32 %v1681_v18  ;;  %v971_v18 = vadd.f32 %v915_v31, %v859_v11  ;;  %v961_v43 = vadd.f32 1.0, %v2074_v32  ;;  %v938_v59 = vadd.f32 1.0, %v937_v40  ;;  %v2123_v31 = vld [vmem:[%s2262_s1 + $0x30] sm:$0xff] }
 0x1ae   :  { %1464 = vrcp.f32 %v1694_v23  ;;  %v970_v23 = vadd.f32 %v906_v28, %v858_v1  ;;  %v924_v52 = vsel %vm2082_vm7, %v921_v38, %v918_v22  ;;  %v949_v10 = vand.u32 2147483647, %v2053_v60 }
 0x1af   :  { %1466 = vlog2.f32 %v952_v29  ;;  %v1043_v57 = vmul.f32 %v971_v18, %v971_v18  ;;  %v972_v19 = vadd.f32 %v924_v52, %v860_v48  ;;  %v948_v20 = vmul.f32 %v2053_v60, %v947_v51  ;;  %v698_v29 = vpop.f32.mrf.mxu1 }
 0x1b0   :  { %1468 = vrcp.f32 %v2095_v55  ;;  %v1042_v7 = vmul.f32 %v970_v23, %v970_v23  ;;  %v939_v17 = vmul.f32 %v2051_v58, %v938_v59  ;;  %v955_v25 = vmul.f32 -0.5, %v2059_v14  ;;  %v1530_v59 = vld [vmem:[%s2261_s0 + $0x8] sm:$0xff] }
 0x1b1   :  { %1470 = vrcp.f32 %v2103_v62  ;;  %v1051_v56 = vmul.f32 2.0, %v1043_v57  ;;  %vm2116_vm9 = vcmp.lt.f32.partialorder %v940_v63, 0.0004427343  ;;  %vm2126_vm10 = vcmp.lt.f32.partialorder %v949_v10, 0.0004427343  ;;  %v1324_v41 = vpop.f32.mrf.mxu1 }
 0x1b2   :  { %1472 = vlog2.f32 %v961_v43  ;;  %v1050_v60 = vmul.f32 2.0, %v1042_v7  ;;  %v1044_v1 = vmul.f32 %v972_v19, %v972_v19  ;;  %v862_v3 = vmax.f32 %v2041_v33, 0.0 }
 0x1b3   :  { %1474 = vrcp.f32 %v2123_v31  ;;  %v863_v28 = vmax.f32 %v2038_v35, 0.0  ;;  %v956_v38 = vadd.f32 1.0, %v955_v25  ;;  %v958_v40 = vand.u32 2147483647, %v2059_v14  ;;  %v2143_v35 = vld [vmem:[%s2262_s1 + $0x38] sm:$0xff]  ;;  %v1533_v25 = vld [vmem:[%s2262_s1] sm:$0xff] }
 0x1b4   :  { %vm428_vm15 = vcmp.eq.s32.totalorder %v1909_v6, %v2108_v0  ;;  %vm1118_vm5 = vcmask 8192  }
 0x1b5   :  { %v1453_v36 = vpop.eup %1452  ;;  %v957_v51 = vmul.f32 %v2059_v14, %v956_v38  ;;  %vm2149_vm11 = vcmp.lt.f32.partialorder %v958_v40, 0.0004427343 }
 0x1b6   :  { %v927_v16 = vmul.f32 0.6931472, %v1453_v36  ;;  %v1455_v44 = vpop.eup %1454  ;;  %v2131_v36 = vpop.permute.xlu1 %472 }
 0x1b7   :  { %v1457_v54 = vpop.eup %1456  ;;  %v979_v8 = vmul.f32 %v1455_v44, %v970_v23  ;;  %v964_v23 = vmul.f32 -0.5, %v2074_v32  ;;  %vm483_vm13 = vcmp.eq.s32.totalorder %v1909_v6, %v2131_v36 }
 0x1b8   :  { %v1459_v61 = vpop.eup %1458  ;;  %v933_v9 = vsel %vm2087_vm8, %v930_v42, %v927_v16  ;;  %v981_v49 = vmul.f32 %v1457_v54, %v971_v18  ;;  %v1052_v16 = vmul.f32 2.0, %v1044_v1 }
 0x1b9   :  { %v1461_v4 = vpop.eup %1460  ;;  %v936_v24 = vmul.f32 0.6931472, %v1459_v61  ;;  %v973_v50 = vadd.f32 %v933_v9, %v861_v21  ;;  %v1019_v61 = vsub.f32 %v1530_v59, %v1321_v2  ;;  %v1531_v21 = vld [vmem:[%s2261_s0] sm:$0xff]  ;;  %v965_v14 = vadd.f32 1.0, %v964_v23  ;;  %v1532_v9 = vld [vmem:[%s2262_s1 + $0x8] sm:$0xff]  ;;  %v1536_v23 = vld [vmem:[%s2262_s1 + $0x18] sm:$0xff] }
 0x1ba   :  { %v945_v11 = vmul.f32 0.6931472, %v1461_v4  ;;  %v1463_v5 = vpop.eup %1462  ;;  %1476 = vlog2.f32 %v981_v49  ;;  %v2146_v43 = vpop.permute.xlu1 %475  ;;  %v1018_v63 = vsub.f32 %v1531_v21, %v698_v29  ;;  %v1011_v10 = vmul.f32 %v1532_v9, %v1532_v9 }
 0x1bb   :  { %v1465_v30 = vpop.eup %1464  ;;  %1478 = vrcp.f32 %v1051_v56  ;;  %v942_v37 = vsel %vm2116_vm9, %v939_v17, %v936_v24  ;;  %v1045_v18 = vmul.f32 %v973_v50, %v973_v50  ;;  %v983_v33 = vmul.f32 %v1463_v5, %v972_v19  ;;  %v708_v4 = vpop.f32.mrf.mxu1 }
 0x1bc   :  { %v1467_v39 = vpop.eup %1466  ;;  %1480 = vlog2.f32 %v979_v8  ;;  %v951_v22 = vsel %vm2126_vm10, %v948_v20, %v945_v11  ;;  %v974_v42 = vadd.f32 %v942_v37, %v862_v3  ;;  %v985_v44 = vmul.f32 %v1465_v30, %v973_v50  ;;  %v1534_v37 = vld [vmem:[%s2261_s0 + $0x10] sm:$0xff] }
 0x1bd   :  { %1482 = vrcp.f32 %v1050_v60  ;;  %v975_v47 = vadd.f32 %v951_v22, %v863_v28  ;;  %v954_v48 = vmul.f32 0.6931472, %v1467_v39  ;;  %v1469_v54 = vpop.eup %1468  ;;  %v1053_v57 = vmul.f32 2.0, %v1045_v18  ;;  %v1327_v29 = vpop.f32.mrf.mxu1  ;;  %v1535_v22 = vld [vmem:[%s2261_s0 + $0x18] sm:$0xff] }
 0x1be   :  { %1484 = vrcp.f32 %v2143_v35  ;;  %v1471_v7 = vpop.eup %1470  ;;  %v1046_v19 = vmul.f32 %v974_v42, %v974_v42  ;;  %v967_v20 = vand.u32 2147483647, %v2074_v32  ;;  %v864_v2 = vmax.f32 %v2047_v15, 0.0 }
 0x1bf   :  { %1486 = vlog2.f32 %v983_v33  ;;  %v1473_v49 = vpop.eup %1472  ;;  %v1047_v24 = vmul.f32 %v975_v47, %v975_v47  ;;  %v960_v17 = vsel %vm2149_vm11, %v957_v51, %v954_v48  ;;  %v1010_v8 = vmul.f32 %v1533_v25, %v1533_v25 }
 0x1c0   :  { %1488 = vrcp.f32 %v1052_v16  ;;  %v989_v50 = vmul.f32 %v1471_v7, %v975_v47  ;;  %v1027_v11 = vmul.f32 %v1019_v61, %v1019_v61  ;;  %v1026_v27 = vmul.f32 %v1018_v63, %v1018_v63  ;;  %v1475_v30 = vpop.eup %1474  ;;  %v1538_v63 = vld [vmem:[%s2261_s0 + $0x28] sm:$0xff]  ;;  %v1539_v7 = vld [vmem:[%s2261_s0 + $0x20] sm:$0xff] }
 0x1c1   :  { %1490 = vlog2.f32 %v985_v44  ;;  %v987_v60 = vmul.f32 %v1469_v54, %v974_v42  ;;  %v963_v58 = vmul.f32 0.6931472, %v1473_v49  ;;  %v966_v15 = vmul.f32 %v2074_v32, %v965_v14  ;;  %v718_v42 = vpop.f32.mrf.mxu1 }
 0x1c2   :  { %1492 = vrcp.f32 %v1053_v57  ;;  %v1054_v1 = vmul.f32 2.0, %v1046_v19  ;;  %vm2170_vm12 = vcmp.lt.f32.partialorder %v967_v20, 0.0004427343  ;;  %v976_v28 = vadd.f32 %v960_v17, %v864_v2 }
 0x1c3   :  { %v1020_v38 = vsub.f32 %v1534_v37, %v708_v4  ;;  %v1055_v18 = vmul.f32 2.0, %v1047_v24  ;;  %v1021_v32 = vsub.f32 %v1535_v22, %v1324_v41  ;;  %v865_v33 = vmax.f32 %v2045_v34, 0.0  ;;  %v1537_v34 = vld [vmem:[%s2262_s1 + $0x10] sm:$0xff]  ;;  %v1330_v19 = vpop.f32.mrf.mxu1 }
 0x1c4   :  { %v1013_v16 = vmul.f32 %v1536_v23, %v1536_v23  ;;  %v969_v47 = vsel %vm2170_vm12, %v966_v15, %v963_v58  ;;  %v1035_v48 = vadd.f32 %v1027_v11, %v1011_v10  ;;  %v1034_v51 = vadd.f32 %v1026_v27, %v1010_v8  ;;  %v1540_v22 = vld [vmem:[%s2261_s0 + $0x30] sm:$0xff] }
 0x1c5   :  { %v1048_v57 = vmul.f32 %v976_v28, %v976_v28  ;;  %v1012_v52 = vmul.f32 %v1537_v34, %v1537_v34  ;;  %v1028_v59 = vmul.f32 %v1020_v38, %v1020_v38  ;;  %v1029_v21 = vmul.f32 %v1021_v32, %v1021_v32 }
 0x1c6   :  { %v1023_v4 = vsub.f32 %v1538_v63, %v1327_v29  ;;  %v1022_v14 = vsub.f32 %v1539_v7, %v718_v42  ;;  %v977_v9 = vadd.f32 %v969_v47, %v865_v33  ;;  %v991_v10 = vmul.f32 %v1475_v30, %v976_v28  ;;  %v728_v30 = vpop.f32.mrf.mxu1 }
 0x1c7   :  { %v1477_v39 = vpop.eup %1476  ;;  %v1056_v25 = vmul.f32 2.0, %v1048_v57  ;;  %v1036_v8 = vadd.f32 %v1028_v59, %v1012_v52  ;;  %v1015_v11 = vmul.f32 %v2103_v62, %v2103_v62  ;;  %v1014_v27 = vmul.f32 %v2095_v55, %v2095_v55 }
 0x1c8   :  { %v1479_v40 = vpop.eup %1478  ;;  %v997_v49 = vmul.f32 0.6931472, %v1477_v39  ;;  %v2201_v29 = vmul.f32 %v2143_v35, %v2143_v35  ;;  %v1037_v58 = vadd.f32 %v1029_v21, %v1013_v16  ;;  %v1031_v15 = vmul.f32 %v1023_v4, %v1023_v4 }
 0x1c9   :  { %v1481_v44 = vpop.eup %1480  ;;  %v1061_v2 = vmul.f32 %v1479_v40, %v1035_v48  ;;  %v1030_v38 = vmul.f32 %v1022_v14, %v1022_v14  ;;  %v1024_v32 = vsub.f32 %v1540_v22, %v728_v30  ;;  %v1173_v48 = vsel %vm483_vm13, 1.0, %v1570_v46 }
 0x1ca   :  { %v1483_v41 = vpop.eup %1482  ;;  %v1039_v34 = vadd.f32 %v1031_v15, %v1015_v11  ;;  %v507_v36 = vadd.f32 %v1173_v48, %v1986_v12  ;;  %vm484_vm3 = vcmp.eq.s32.totalorder %v1909_v6, %v2146_v43 }
 0x1cb   :  { %v1485_v61 = vpop.eup %1484  ;;  %v1059_v24 = vmul.f32 %v1483_v41, %v1034_v51  ;;  %v1075_v28 = vadd.f32 %v1061_v2, %v997_v49  ;;  %v1038_v52 = vadd.f32 %v1030_v38, %v1014_v27  ;;  %v1032_v63 = vmul.f32 %v1024_v32, %v1024_v32 }
 0x1cc   :  { %v1487_v17 = vpop.eup %1486  ;;  %v993_v39 = vmul.f32 %v1485_v61, %v977_v9  ;;  %v1541_v61 = vld [vmem:[%s2261_s0 + $0x38] sm:$0xff] }
 0x1cd   :  { %v999_v55 = vmul.f32 0.6931472, %v1487_v17  ;;  %v1025_v21 = vsub.f32 %v1541_v61, %v1330_v19 }
 0x1cf   :  { %v1033_v22 = vmul.f32 %v1025_v21, %v1025_v21 }
 0x1d1   :  { %v1041_v43 = vadd.f32 %v1033_v22, %v2201_v29 }
 0x1f3   :  { %v254_v5 = vpop.xlane.xlu0 %253 }
 0x1f5   :  { %v252_v56 = vpop.xlane.xlu1 %251 }
 0x1f6   :  { %1494 = vlog2.f32 %v252_v56  ;;  %v995_v56 = vmul.f32 0.6931472, %v1481_v44 }
 0x1f7   :  { %1496 = vlog2.f32 %v254_v5 }
 0x1f8   :  { %1498 = vlog2.f32 %v989_v50  ;;  %v1489_v50 = vpop.eup %1488  ;;  %v1074_v37 = vadd.f32 %v1059_v24, %v995_v56 }
 0x1f9   :  { %1500 = vlog2.f32 %v987_v60  ;;  %v258_v54 = vpop.xlane.xlu0 %257  ;;  %v1491_v5 = vpop.eup %1490  ;;  %v1049_v60 = vmul.f32 %v977_v9, %v977_v9  ;;  %v1063_v35 = vmul.f32 %v1489_v50, %v1036_v8 }
 0x1fa   :  { %1502 = vrcp.f32 %v1054_v1  ;;  %v1493_v3 = vpop.eup %1492  ;;  %v1001_v16 = vmul.f32 0.6931472, %v1491_v5  ;;  %v1199_v51 = vadd.f32 -0.5, %v1074_v37 }
 0x1fb   :  { %1504 = vrcp.f32 %v1055_v18  ;;  %v1016_v18 = vmul.f32 %v2123_v31, %v2123_v31  ;;  %v1057_v23 = vmul.f32 2.0, %v1049_v60  ;;  %v1065_v42 = vmul.f32 %v1493_v3, %v1037_v58 }
 0x1fc   :  { %1506 = vlog2.f32 %v258_v54  ;;  %v1200_v31 = vadd.f32 -0.5, %v1075_v28  ;;  %v1076_v57 = vadd.f32 %v1063_v35, %v999_v55 }
 0x1fd   :  { %v256_v20 = vpop.xlane.xlu1 %255  ;;  %v1077_v14 = vadd.f32 %v1065_v42, %v1001_v16 }
 0x1fe   :  { %1508 = vlog2.f32 %v256_v20  ;;  %v1091_v49 = vsel %vm81_vm0, %v1200_v31, 0.0  ;;  %v1090_v20 = vsel %vm81_vm0, %v1199_v51, 0.0  ;;  %v1201_v56 = vadd.f32 -0.5, %v1076_v57 }
 0x1ff   :  { %1510 = vlog2.f32 %v991_v10  ;;  %v1202_v11 = vadd.f32 -0.5, %v1077_v14  ;;  %v1092_v15 = vadd.f32 %v1091_v49, %v1090_v20 }
 0x200   :  { %v1093_v37 = vsel %vm81_vm0, %v1201_v56, 0.0 }
 0x201   :  { %v260_v1 = vpop.xlane.xlu1 %259  ;;  %v262_v40 = vpop.xlane.xlu0 %261  ;;  %v1095_v0 = vsel %vm81_vm0, %v1202_v11, 0.0  ;;  %v1094_v16 = vadd.f32 %v1093_v37, %v1092_v15 }
 0x202   :  { %1512 = vlog2.f32 %v260_v1 }
 0x203   :  { %v1495_v62 = vpop.eup %1494  ;;  %1514 = vrcp.f32 %v1056_v25 }
 0x204   :  { %v1497_v33 = vpop.eup %1496  ;;  %1516 = vlog2.f32 %v262_v40  ;;  %v268_v54 = vmul.f32 0.6931472, %v1495_v62  ;;  %v1040_v62 = vadd.f32 %v1032_v63, %v1016_v18 }
 0x205   :  { %v264_v44 = vpop.xlane.xlu1 %263  ;;  %v1499_v47 = vpop.eup %1498  ;;  %v270_v4 = vmul.f32 0.6931472, %v1497_v33 }
 0x206   :  { %v1501_v41 = vpop.eup %1500  ;;  %1518 = vlog2.f32 %v264_v44  ;;  %v590_v2 = vsel %vm589_vm14, %v268_v54, 0.0  ;;  %v1005_v27 = vmul.f32 0.6931472, %v1499_v47  ;;  %v266_v40 = vpop.xlane.xlu0 %265 }
 0x207   :  { %v1503_v59 = vpop.eup %1502  ;;  %1520 = vlog2.f32 %v993_v39  ;;  %v1003_v24 = vmul.f32 0.6931472, %v1501_v41  ;;  %v591_v12 = vsel %vm589_vm14, %v270_v4, 0.0  ;;  %v1166_v39 = vsel %vm428_vm15, 1.0, %v1570_v46 }
 0x208   :  { %v1505_v7 = vpop.eup %1504  ;;  %1522 = vrcp.f32 %v1057_v23  ;;  %v1067_v17 = vmul.f32 %v1503_v59, %v1038_v52  ;;  %v592_v5 = vadd.f32 %v591_v12, %v590_v2  ;;  %v1174_v41 = vsel %vm484_vm3, 1.0, %v1570_v46 }
 0x209   :  { %v529_v9 = vpop.permute.xlu1 %528  ;;  %v1507_v10 = vpop.eup %1506  ;;  %v1069_v30 = vmul.f32 %v1505_v7, %v1039_v34  ;;  %1524 = vlog2.f32 %v266_v40  ;;  %v1096_v59 = vadd.f32 %v1095_v0, %v1094_v16 }
 0x20a   :  { %vm539_vm1 = vcmp.eq.s32.totalorder %v1909_v6, %v529_v9  ;;  %v274_v60 = vmul.f32 0.6931472, %v1507_v10  ;;  %v1078_v38 = vadd.f32 %v1067_v17, %v1003_v24 }
 0x20b   :  { %v1509_v19 = vpop.eup %1508  ;;  %v1181_v25 = vsel %vm539_vm1, 1.0, %v1570_v46  ;;  %v1079_v42 = vadd.f32 %v1069_v30, %v1005_v27 }
 0x20c   :  { %v272_v8 = vmul.f32 0.6931472, %v1509_v19  ;;  %v563_v50 = vadd.f32 %v1181_v25, %v507_v36  ;;  %v1511_v58 = vpop.eup %1510  ;;  %v595_v18 = vsel %vm589_vm14, %v274_v60, 0.0  ;;  %v1203_v48 = vadd.f32 -0.5, %v1078_v38 }
 0x20d   :  { %v1007_v47 = vmul.f32 0.6931472, %v1511_v58  ;;  %v1204_v61 = vadd.f32 -0.5, %v1079_v42  ;;  %v532_v36 = vpop.permute.xlu0 %531 }
 0x20e   :  { %v593_v1 = vsel %vm589_vm14, %v272_v8, 0.0  ;;  %v571_v3 = vmul.f32 %v563_v50, %v2008_v45  ;;  %v1158_v45 = vsel %vm372_vm2, 1.0, %v1570_v46  ;;  %v1097_v4 = vsel %vm81_vm0, %v1203_v48, 0.0 }
 0x20f   :  { %v1513_v28 = vpop.eup %1512  ;;  %v594_v55 = vadd.f32 %v593_v1, %v592_v5  ;;  %v452_v26 = vadd.f32 %v1166_v39, %v1158_v45  ;;  %vm540_vm4 = vcmp.eq.s32.totalorder %v1909_v6, %v532_v36  ;;  %v1098_v20 = vadd.f32 %v1097_v4, %v1096_v59 }
 0x210   :  { %v1515_v35 = vpop.eup %1514  ;;  %v276_v32 = vmul.f32 0.6931472, %v1513_v28  ;;  %v578_v33 = vadd.f32 %v2023_v13, %v571_v3  ;;  %v1182_v49 = vsel %vm540_vm4, 1.0, %v1570_v46  ;;  %v1099_v24 = vsel %vm81_vm0, %v1204_v61, 0.0 }
 0x211   :  { %v1517_v23 = vpop.eup %1516  ;;  %v596_v44 = vadd.f32 %v595_v18, %v594_v55  ;;  %v1071_v13 = vmul.f32 %v1515_v35, %v1040_v62  ;;  %v508_v7 = vadd.f32 %v1174_v41, %v452_v26  ;;  %v1100_v50 = vadd.f32 %v1099_v24, %v1098_v20 }
 0x212   :  { %v597_v31 = vsel %vm589_vm14, %v276_v32, 0.0  ;;  %v278_v57 = vmul.f32 0.6931472, %v1517_v23 }
 0x213   :  { %v1519_v51 = vpop.eup %1518  ;;  %v598_v52 = vadd.f32 %v597_v31, %v596_v44  ;;  %v1080_v63 = vadd.f32 %v1071_v13, %v1007_v47  ;;  %v564_v2 = vadd.f32 %v1182_v49, %v508_v7 }
 0x214   :  { %v1521_v54 = vpop.eup %1520  ;;  %v280_v21 = vmul.f32 0.6931472, %v1519_v51  ;;  %v599_v9 = vsel %vm589_vm14, %v278_v57, 0.0 }
 0x215   :  { %v1523_v34 = vpop.eup %1522  ;;  %v1009_v10 = vmul.f32 0.6931472, %v1521_v54  ;;  %v600_v29 = vadd.f32 %v599_v9, %v598_v52  ;;  %v1205_v56 = vadd.f32 -0.5, %v1080_v63  ;;  %v572_v17 = vmul.f32 %v564_v2, %v2014_v53 }
 0x216   :  { %v1073_v14 = vmul.f32 %v1523_v34, %v1041_v43  ;;  %v601_v19 = vsel %vm589_vm14, %v280_v21, 0.0  ;;  %v1525_v12 = vpop.eup %1524 }
 0x217   :  { %v602_v8 = vadd.f32 %v601_v19, %v600_v29  ;;  %v282_v11 = vmul.f32 0.6931472, %v1525_v12  ;;  %v579_v27 = vadd.f32 %v578_v33, %v572_v17  ;;  %v1101_v5 = vsel %vm81_vm0, %v1205_v56, 0.0 }
 0x218   :  { %v1081_v25 = vadd.f32 %v1073_v14, %v1009_v10  ;;  %v1102_v15 = vadd.f32 %v1101_v5, %v1100_v50 }
 0x219   :  { %580 = vadd.xlane.f32.xlu1 %v579_v27  ;;  %v603_v46 = vsel %vm589_vm14, %v282_v11, 0.0 }
 0x21a   :  { %v1206_v60 = vadd.f32 -0.5, %v1081_v25  ;;  %v604_v58 = vadd.f32 %v603_v46, %v602_v8 }
 0x21c   :  { %605 = vadd.xlane.f32.xlu0 %v604_v58  ;;  %v1103_v30 = vsel %vm81_vm0, %v1206_v60, 0.0  ;;  %vm1114_vm0 = vcmp.eq.s32.totalorder %v1909_v6, 0 }
 0x21d   :  { %v1104_v1 = vadd.f32 %v1103_v30, %v1102_v15 }
 0x220   :  { %1105 = vadd.xlane.f32.xlu0 %v1104_v1 }
 0x2a2   :  { %v581_v53 = vpop.xlane.xlu1 %580 }
 0x2a3   :  { %v582_v3 = vrot.slane %v581_v53, 4 }
 0x2a5   :  { %v583_v28 = vadd.f32 %v582_v3, %v581_v53  ;;  %v606_v37 = vpop.xlane.xlu0 %605 }
 0x2a6   :  { %v607_v38 = vrot.slane %v606_v37, 4 }
 0x2a7   :  { %v584_v62 = vrot.slane %v583_v28, 2 }
 0x2a8   :  { %v608_v55 = vadd.f32 %v607_v38, %v606_v37 }
 0x2a9   :  { %v1106_v35 = vpop.xlane.xlu0 %1105  ;;  %v585_v39 = vadd.f32 %v584_v62, %v583_v28 }
 0x2aa   :  { %v609_v22 = vrot.slane %v608_v55, 2  ;;  %v1107_v32 = vrot.slane %v1106_v35, 4 }
 0x2ab   :  { %v586_v40 = vrot.slane %v585_v39, 1 }
 0x2ac   :  { %v1108_v33 = vadd.f32 %v1107_v32, %v1106_v35  ;;  %v610_v45 = vadd.f32 %v609_v22, %v608_v55 }
 0x2ad   :  { %v587_v18 = vadd.f32 %v586_v40, %v585_v39 }
 0x2ae   :  { %v1109_v23 = vrot.slane %v1108_v33, 2  ;;  %v611_v0 = vrot.slane %v610_v45, 1 }
 0x2af   :  { %1375 = vpush %v587_v18 }
 0x2b0   :  { %v1110_v16 = vadd.f32 %v1109_v23, %v1108_v33  ;;  %v612_v42 = vadd.f32 %v611_v0, %v610_v45 }
 0x2b2   :  { %1377 = vpush %v612_v42  ;;  %v1111_v44 = vrot.slane %v1110_v16, 1 }
 0x2b4   :  { %v1112_v47 = vadd.f32 %v1111_v44, %v1110_v16 }
 0x2b6   :  { %1379 = vpush %v1112_v47 }
 0x2e0   :  { %s1376_s0 = spop %1375 }
 0x2e3   :  { %s1378_s22 = spop %1377 }
 0x2e4   :  { %s614_s23 = smul.f32 4.0, %s1378_s22 }
 0x2e6   :  { %s615_s26 = ssub.f32 %s1376_s0, %s614_s23 }
 0x2e7   :  { %s1380_s4 = spop %1379 }
 0x2e8   :  { %v1115_v48 = vstv %s615_s26  ;;  %v1116_v13 = vstv %s1380_s4 }
 0x2e9   :  { %v1117_v31 = vsel %vm1114_vm0, %v1115_v48, %v1116_v13 }
 0x2ea   :  { %1119 = vst.msk [vmem:[#allocation2] sm:$0x1] %vm1118_vm5, %v1117_v31 }
 0x2eb   :  { %1553 = shalt.err (!%p1550_p4)
}
 0x2ec   :  { %1129 = dma.vmem_to_hbm [thread:$0]  %s1127_s25, 16, %s2269_s8, [#allocation3]  }
 0x2ed   :  { %1562 = dma.done.wait [#allocation3], 16  }
 0x2ee   :  { %1563 = vsyncadd [#allocation3], 4294967280 }
 0x2ef   :  { %1133 = vsyncpa [#allocation3], 1 }

</bundles_post_ra>
